<compile_context>
chip_gen: v7x
topology: tpu7x:2x2x1
jax: 0.10.0
libtpu: 0.0.40
codegen_flags: <defaults>
</compile_context>

<pallas_src>
import functools
import jax
import jax.numpy as jnp
from jax.experimental import pallas as pl
from jax.experimental.pallas import tpu as pltpu


# ------------------------------- helpers -----------------------------------

def _round_up(x, m):
    return (x + m - 1) // m * m


def _gelu(x):
    # exact (erf-based) GELU, matching BERT's ACT2FN["gelu"]
    return 0.5 * x * (1.0 + jax.lax.erf(x * jnp.float32(0.7071067811865476)))


def _layernorm(x, gamma, beta, eps=1e-12):
    # f32 statistics to preserve BERT numerics (eps=1e-12 is meaningless in bf16)
    mu = jnp.mean(x, axis=-1, keepdims=True)
    var = jnp.mean((x - mu) ** 2, axis=-1, keepdims=True)
    return (x - mu) * jax.lax.rsqrt(var + eps) * gamma + beta


def _vocab_tiling(vocab, v_tile_cap):
    tn_v = min(v_tile_cap, _round_up(vocab, 128))
    v_pad = _round_up(vocab, tn_v)
    return tn_v, v_pad


def _row_tiling(rows, row_tile_cap):
    row_tile = min(row_tile_cap, _round_up(rows, 8))
    rows_p = _round_up(rows, row_tile)
    # v7x megacore: keep an even number of "parallel" row tiles, but only when
    # padding is already needed (otherwise it would force a costly output crop).
    n_tiles = rows_p // row_tile
    if n_tiles > 1 and n_tiles % 2 == 1 and rows_p != rows:
        rows_p += row_tile
    return row_tile, rows_p


def _default_vmem_limit():
    # Generation-aware scoped-VMEM limit with headroom for Mosaic scratch:
    # ~110 MiB on v5e/v6e (128 MiB physical), ~48 MiB on v7x (64 MiB physical).
    cap = 128 * 1024 * 1024
    try:
        info = pltpu.get_tpu_info()
        cap = int(getattr(info, "vmem_capacity_bytes", cap))
    except Exception:
        pass
    return max(32 * 1024 * 1024, min(cap - 16 * 1024 * 1024, 110 * 1024 * 1024))


def _pad_vocab(w, b, vocab, v_tile_cap):
    """Return decoder weight/bias whose lane dim is a multiple of the vocab tile.

    If they were already padded at init time this is a static no-op (no copy).
    """
    tn_v, v_pad = _vocab_tiling(vocab, v_tile_cap)
    W = w.shape[1]
    if W % tn_v != 0:
        v_pad = _round_up(W, tn_v)
    else:
        v_pad = max(v_pad, W)
    if W < v_pad:
        w = jnp.pad(w, ((0, 0), (0, v_pad - W)))
        b = jnp.pad(b, ((0, 0), (0, v_pad - W)))
    return w, b, tn_v, v_pad


# --------------------------- LM prediction head ----------------------------
# transform: dense(H->H) + gelu + LayerNorm (cached in bf16 scratch), then
# decoder(H -> Vtile) + bias, stored as bf16.

def _lm_head_kernel(x_ref, w1_ref, b1_ref, g1_ref, be1_ref,
                    wd_ref, bd_ref, out_ref, h_scr):
    # Compute the transform once per row tile (vocab-tile index == 0) and cache
    # it (bf16) in VMEM scratch; reuse for every vocab tile of this row tile.
    # Correct only because the vocab axis is the inner, sequential grid axis.
    @pl.when(pl.program_id(1) == 0)
    def _():
        x = x_ref[...].astype(jnp.bfloat16)                     # bf16 MXU operand
        h = jnp.dot(x, w1_ref[...], preferred_element_type=jnp.float32)
        h = _gelu(h + b1_ref[...])
        h = _layernorm(h, g1_ref[...], be1_ref[...])
        h_scr[...] = h.astype(jnp.bfloat16)                     # cast once

    s = jnp.dot(h_scr[...], wd_ref[...], preferred_element_type=jnp.float32)
    out_ref[...] = (s + bd_ref[...]).astype(out_ref.dtype)


def lm_prediction_head(x2d, params, vocab, *, row_tile_cap=1024, v_tile_cap=2048,
                       out_dtype=jnp.bfloat16, vmem_limit_bytes=None):
    rows, H = x2d.shape
    wd, bd, tn_v, v_pad = _pad_vocab(params["decoder_w"], params["decoder_b"],
                                     vocab, v_tile_cap)
    row_tile, rows_p = _row_tiling(rows, row_tile_cap)
    if rows_p != rows:
        x2d = jnp.pad(x2d, ((0, rows_p - rows), (0, 0)))
    if vmem_limit_bytes is None:
        vmem_limit_bytes = _default_vmem_limit()

    grid = (rows_p // row_tile, v_pad // tn_v)
    full = lambda i, j: (0, 0)

    out = pl.pallas_call(
        _lm_head_kernel,
        out_shape=jax.ShapeDtypeStruct((rows_p, v_pad), out_dtype),
        grid_spec=pltpu.PrefetchScalarGridSpec(
            num_scalar_prefetch=0,
            grid=grid,
            in_specs=[
                pl.BlockSpec((row_tile, H), lambda i, j: (i, 0)),   # x rows
                pl.BlockSpec((H, H), full),                         # dense_w (resident)
                pl.BlockSpec((1, H), full),                         # dense_b
                pl.BlockSpec((1, H), full),                         # ln gamma
                pl.BlockSpec((1, H), full),                         # ln beta
                pl.BlockSpec((H, tn_v), lambda i, j: (0, j)),       # decoder_w tile
                pl.BlockSpec((1, tn_v), lambda i, j: (0, j)),       # decoder_b tile
            ],
            out_specs=pl.BlockSpec((row_tile, tn_v), lambda i, j: (i, j)),
            scratch_shapes=[pltpu.VMEM((row_tile, H), jnp.bfloat16)],
        ),
        compiler_params=pltpu.CompilerParams(
            dimension_semantics=("parallel", "arbitrary"),
            vmem_limit_bytes=vmem_limit_bytes),
    )(x2d, params["dense_w"], params["dense_b"], params["ln_g"], params["ln_b"],
      wd, bd)

    if rows_p != rows or v_pad != vocab:           # static check; no-op when aligned
        out = out[:rows, :vocab]
    return out


# ------------------------- pair target prediction --------------------------
# MLPWithLayerNorm(3H -> H): linear1 + gelu + LN1, linear2 + gelu + LN2
# (cached in bf16 scratch), then decoder(H -> Vtile) + bias, stored as bf16.

def _pair_head_kernel(x_ref, w1_ref, b1_ref, g1_ref, be1_ref,
                      w2_ref, b2_ref, g2_ref, be2_ref,
                      wd_ref, bd_ref, out_ref, h_scr):
    @pl.when(pl.program_id(1) == 0)
    def _():
        x = x_ref[...].astype(jnp.bfloat16)
        h = jnp.dot(x, w1_ref[...], preferred_element_type=jnp.float32)
        h = _layernorm(_gelu(h + b1_ref[...]), g1_ref[...], be1_ref[...])
        h = jnp.dot(h.astype(jnp.bfloat16), w2_ref[...],
                    preferred_element_type=jnp.float32)
        h = _layernorm(_gelu(h + b2_ref[...]), g2_ref[...], be2_ref[...])
        h_scr[...] = h.astype(jnp.bfloat16)

    s = jnp.dot(h_scr[...], wd_ref[...], preferred_element_type=jnp.float32)
    out_ref[...] = (s + bd_ref[...]).astype(out_ref.dtype)


def pair_target_head(x2d, params, vocab, *, row_tile_cap=1024, v_tile_cap=2048,
                     out_dtype=jnp.bfloat16, vmem_limit_bytes=None):
    rows, H3 = x2d.shape
    H = params["w2"].shape[0]
    wd, bd, tn_v, v_pad = _pad_vocab(params["decoder_w"], params["decoder_b"],
                                     vocab, v_tile_cap)
    row_tile, rows_p = _row_tiling(rows, row_tile_cap)
    if rows_p != rows:
        x2d = jnp.pad(x2d, ((0, rows_p - rows), (0, 0)))
    if vmem_limit_bytes is None:
        vmem_limit_bytes = _default_vmem_limit()

    grid = (rows_p // row_tile, v_pad // tn_v)
    full = lambda i, j: (0, 0)

    out = pl.pallas_call(
        _pair_head_kernel,
        out_shape=jax.ShapeDtypeStruct((rows_p, v_pad), out_dtype),
        grid_spec=pltpu.PrefetchScalarGridSpec(
            num_scalar_prefetch=0,
            grid=grid,
            in_specs=[
                pl.BlockSpec((row_tile, H3), lambda i, j: (i, 0)),  # concat rows
                pl.BlockSpec((H3, H), full),                        # w1 (resident)
                pl.BlockSpec((1, H), full),
                pl.BlockSpec((1, H), full),
                pl.BlockSpec((1, H), full),
                pl.BlockSpec((H, H), full),                         # w2 (resident)
                pl.BlockSpec((1, H), full),
                pl.BlockSpec((1, H), full),
                pl.BlockSpec((1, H), full),
                pl.BlockSpec((H, tn_v), lambda i, j: (0, j)),       # decoder_w tile
                pl.BlockSpec((1, tn_v), lambda i, j: (0, j)),       # decoder_b tile
            ],
            out_specs=pl.BlockSpec((row_tile, tn_v), lambda i, j: (i, j)),
            scratch_shapes=[pltpu.VMEM((row_tile, H), jnp.bfloat16)],
        ),
        compiler_params=pltpu.CompilerParams(
            dimension_semantics=("parallel", "arbitrary"),
            vmem_limit_bytes=vmem_limit_bytes),
    )(x2d, params["w1"], params["b1"], params["ln1_g"], params["ln1_b"],
      params["w2"], params["b2"], params["ln2_g"], params["ln2_b"], wd, bd)

    if rows_p != rows or v_pad != vocab:
        out = out[:rows, :vocab]
    return out


# ------------------------------ full module --------------------------------

def bert_pretraining_heads(sequence_output, pairs, lm_params, pair_params, vocab,
                           *, row_tile_cap=1024, v_tile_cap=2048,
                           out_dtype=jnp.bfloat16):
    B, S, H = sequence_output.shape
    _, P, _ = pairs.shape

    # --- predictions (LM head) ---
    x2d = sequence_output.reshape(B * S, H)
    lm_scores = lm_prediction_head(x2d, lm_params, vocab,
                                   row_tile_cap=row_tile_cap,
                                   v_tile_cap=v_tile_cap, out_dtype=out_dtype)
    prediction_scores = lm_scores.reshape(B, S, vocab)

    # --- pair target head: gather left/here/right hidden states ---
    # Gather + concat stays in the XLA wrapper; fusing it into the kernel via
    # scalar-prefetch row gather is a further optimization (saves one HBM
    # round-trip of the (B*P, 3H) slab) -- only meaningful at large B*P.
    left, here, right = pairs[:, :, 0], pairs[:, :, 1], pairs[:, :, 2]

    def gather(idx):
        idx3 = jnp.broadcast_to(idx[:, :, None], (B, P, H))
        return jnp.take_along_axis(sequence_output, idx3, axis=1)

    left_h, here_h, right_h = gather(left), gather(here), gather(right)
    # torch.cat((left_hidden, right_hidden, here_hidden), -1)
    cat = jnp.concatenate((left_h, right_h, here_h), axis=-1)
    cat2d = cat.reshape(B * P, 3 * H)
    pair_scores = pair_target_head(cat2d, pair_params, vocab,
                                   row_tile_cap=row_tile_cap,
                                   v_tile_cap=v_tile_cap, out_dtype=out_dtype)
    pair_target_scores = pair_scores.reshape(B, P, vocab)

    return prediction_scores, pair_target_scores


# ----------------------------- parameter init ------------------------------

def init_params(key, hidden, vocab, *, v_tile_cap=2048):
    # Matmul weights stored bf16 (MXU-native, halves decoder-weight HBM
    # streaming); biases / LayerNorm params stay f32.  Decoder weight/bias are
    # padded to the vocab tile HERE, once, so no per-call ~47 MB pad copy.
    _, v_pad = _vocab_tiling(vocab, v_tile_cap)
    ks = jax.random.split(key, 8)
    std = 0.02

    def pad_v(w):
        return jnp.pad(w, ((0, 0), (0, v_pad - vocab)))

    lm = {
        "dense_w": (jax.random.normal(ks[0], (hidden, hidden), jnp.float32)
                    * std).astype(jnp.bfloat16),
        "dense_b": jnp.zeros((1, hidden), jnp.float32),
        "ln_g": jnp.ones((1, hidden), jnp.float32),
        "ln_b": jnp.zeros((1, hidden), jnp.float32),
        "decoder_w": pad_v((jax.random.normal(ks[1], (hidden, vocab), jnp.float32)
                            * std)).astype(jnp.bfloat16),
        "decoder_b": jnp.zeros((1, v_pad), jnp.float32),
    }
    pair = {
        "w1": (jax.random.normal(ks[2], (3 * hidden, hidden), jnp.float32)
               * std).astype(jnp.bfloat16),
        "b1": jnp.zeros((1, hidden), jnp.float32),
        "ln1_g": jnp.ones((1, hidden), jnp.float32),
        "ln1_b": jnp.zeros((1, hidden), jnp.float32),
        "w2": (jax.random.normal(ks[3], (hidden, hidden), jnp.float32)
               * std).astype(jnp.bfloat16),
        "b2": jnp.zeros((1, hidden), jnp.float32),
        "ln2_g": jnp.ones((1, hidden), jnp.float32),
        "ln2_b": jnp.zeros((1, hidden), jnp.float32),
        "decoder_w": pad_v((jax.random.normal(ks[4], (hidden, vocab), jnp.float32)
                            * std)).astype(jnp.bfloat16),
        "decoder_b": jnp.zeros((1, v_pad), jnp.float32),
    }
    return lm, pair


# ------------------------------ pure-JAX ref --------------------------------

def _ref_lm(x2d, p, vocab):
    h = jnp.dot(x2d.astype(jnp.bfloat16), p["dense_w"],
                preferred_element_type=jnp.float32)
    h = _layernorm(_gelu(h + p["dense_b"]), p["ln_g"], p["ln_b"])
    s = jnp.dot(h.astype(jnp.bfloat16), p["decoder_w"],
                preferred_element_type=jnp.float32) + p["decoder_b"]
    return s[:, :vocab]


def _ref_pair(x2d, p, vocab):
    h = jnp.dot(x2d.astype(jnp.bfloat16), p["w1"],
                preferred_element_type=jnp.float32)
    h = _layernorm(_gelu(h + p["b1"]), p["ln1_g"], p["ln1_b"])
    h = jnp.dot(h.astype(jnp.bfloat16), p["w2"],
                preferred_element_type=jnp.float32)
    h = _layernorm(_gelu(h + p["b2"]), p["ln2_g"], p["ln2_b"])
    s = jnp.dot(h.astype(jnp.bfloat16), p["decoder_w"],
                preferred_element_type=jnp.float32) + p["decoder_b"]
    return s[:, :vocab]


# ---------------------------------- main ------------------------------------

if __name__ == "__main__":
    # Small shapes; V=256 with a 128-wide vocab tile and 16-row tiles exercise
    # the multi-step (row, vocab) grid and the cached-transform path with
    # bf16-aligned (16, 128) output tiles.
    B, S, H, V, P = 2, 16, 32, 256, 8
    key = jax.random.PRNGKey(0)
    k_x, k_p, k_w = jax.random.split(key, 3)

    sequence_output = jax.random.normal(k_x, (B, S, H), jnp.float32)
    pairs = jax.random.randint(k_p, (B, P, 3), 0, S, dtype=jnp.int32)
    lm_params, pair_params = init_params(k_w, H, V, v_tile_cap=128)

    fn = jax.jit(functools.partial(bert_pretraining_heads, vocab=V,
                                   row_tile_cap=16, v_tile_cap=128))
    prediction_scores, pair_target_scores = fn(
        sequence_output, pairs, lm_params, pair_params)
    jax.block_until_ready((prediction_scores, pair_target_scores))

    assert prediction_scores.shape == (B, S, V)
    assert pair_target_scores.shape == (B, P, V)
    assert bool(jnp.all(jnp.isfinite(prediction_scores)))
    assert bool(jnp.all(jnp.isfinite(pair_target_scores)))

    # Tolerance-based parity against a pure-JAX reference with the same bf16
    # matmul / f32-accumulation dtype policy (kernel outputs are bf16).
    x2d = sequence_output.reshape(B * S, H)
    ref_pred = _ref_lm(x2d, lm_params, V).reshape(B, S, V)

    def _gidx(c):
        return jnp.broadcast_to(pairs[:, :, c][:, :, None], (B, P, H))
    lh = jnp.take_along_axis(sequence_output, _gidx(0), axis=1)
    hh = jnp.take_along_axis(sequence_output, _gidx(1), axis=1)
    rh = jnp.take_along_axis(sequence_output, _gidx(2), axis=1)
    cat2d = jnp.concatenate((lh, rh, hh), axis=-1).reshape(B * P, 3 * H)
    ref_pair = _ref_pair(cat2d, pair_params, V).reshape(B, P, V)

    assert bool(jnp.allclose(prediction_scores.astype(jnp.float32), ref_pred,
                             atol=2e-2, rtol=2e-2))
    assert bool(jnp.allclose(pair_target_scores.astype(jnp.float32), ref_pair,
                             atol=2e-2, rtol=2e-2))

    print("KERNEL_OK")
</pallas_src>

<mosaic_0001>
module attributes {stable_mosaic.version = 11 : i64} {
  func.func @_pair_head_kernel(%arg0: i32, %arg1: i32, %arg2: memref<16x96xf32, #tpu.memory_space<vmem>>, %arg3: memref<96x32xbf16, #tpu.memory_space<vmem>>, %arg4: memref<1x32xf32, #tpu.memory_space<vmem>>, %arg5: memref<1x32xf32, #tpu.memory_space<vmem>>, %arg6: memref<1x32xf32, #tpu.memory_space<vmem>>, %arg7: memref<32x32xbf16, #tpu.memory_space<vmem>>, %arg8: memref<1x32xf32, #tpu.memory_space<vmem>>, %arg9: memref<1x32xf32, #tpu.memory_space<vmem>>, %arg10: memref<1x32xf32, #tpu.memory_space<vmem>>, %arg11: memref<32x128xbf16, #tpu.memory_space<vmem>>, %arg12: memref<1x128xf32, #tpu.memory_space<vmem>>, %arg13: memref<16x128xbf16, #tpu.memory_space<vmem>>, %arg14: memref<16x32xbf16, #tpu.memory_space<vmem>>) attributes {dimension_semantics = [#tpu.dimension_semantics<parallel>, #tpu.dimension_semantics<arbitrary>], iteration_bounds = array<i64: 1, 2>, scalar_prefetch = 0 : i64, scratch_operands = 1 : i64, tpu.core_type = #tpu.core_type<tc>, window_params = [{transform_indices = @transform_0, window_bounds = array<i64: 16, 96>}, {pipeline_mode = #tpu.pipeline_mode<synchronous>, transform_indices = @transform_1, window_bounds = array<i64: 96, 32>}, {pipeline_mode = #tpu.pipeline_mode<synchronous>, transform_indices = @transform_2, window_bounds = array<i64: 1, 32>}, {pipeline_mode = #tpu.pipeline_mode<synchronous>, transform_indices = @transform_3, window_bounds = array<i64: 1, 32>}, {pipeline_mode = #tpu.pipeline_mode<synchronous>, transform_indices = @transform_4, window_bounds = array<i64: 1, 32>}, {pipeline_mode = #tpu.pipeline_mode<synchronous>, transform_indices = @transform_5, window_bounds = array<i64: 32, 32>}, {pipeline_mode = #tpu.pipeline_mode<synchronous>, transform_indices = @transform_6, window_bounds = array<i64: 1, 32>}, {pipeline_mode = #tpu.pipeline_mode<synchronous>, transform_indices = @transform_7, window_bounds = array<i64: 1, 32>}, {pipeline_mode = #tpu.pipeline_mode<synchronous>, transform_indices = @transform_8, window_bounds = array<i64: 1, 32>}, {transform_indices = @transform_9, window_bounds = array<i64: 32, 128>}, {transform_indices = @transform_10, window_bounds = array<i64: 1, 128>}, {transform_indices = @transform_11, window_bounds = array<i64: 16, 128>}]} {
    %c0_i32 = arith.constant 0 : i32
    %0 = arith.cmpi eq, %arg1, %c0_i32 : i32
    %1 = arith.extui %0 : i1 to i32
    %c0_i32_0 = arith.constant 0 : i32
    %2 = arith.cmpi ne, %1, %c0_i32_0 : i32
    scf.if %2 {
      %c0_8 = arith.constant 0 : index
      %c0_9 = arith.constant 0 : index
      %11 = vector.load %arg2[%c0_8, %c0_9] : memref<16x96xf32, #tpu.memory_space<vmem>>, vector<16x96xf32>
      %12 = arith.truncf %11 : vector<16x96xf32> to vector<16x96xbf16>
      %c0_10 = arith.constant 0 : index
      %c0_11 = arith.constant 0 : index
      %13 = vector.load %arg3[%c0_10, %c0_11] : memref<96x32xbf16, #tpu.memory_space<vmem>>, vector<96x32xbf16>
      %cst_12 = arith.constant dense<0.000000e+00> : vector<16x32xf32>
      %14 = tpu.matmul %12, %13, %cst_12 {dimension_numbers = #tpu.dot_dimension_numbers<[1], [0], [0], [1], [0, 0, 1, 1], [], []>} : vector<16x96xbf16>, vector<96x32xbf16>, vector<16x32xf32> -> vector<16x32xf32>
      %c0_13 = arith.constant 0 : index
      %c0_14 = arith.constant 0 : index
      %15 = vector.load %arg4[%c0_13, %c0_14] : memref<1x32xf32, #tpu.memory_space<vmem>>, vector<1x32xf32>
      %16 = vector.broadcast %15 : vector<1x32xf32> to vector<16x32xf32>
      %17 = arith.addf %14, %16 : vector<16x32xf32>
      %cst_15 = arith.constant 5.000000e-01 : f32
      %18 = vector.broadcast %cst_15 : f32 to vector<16x32xf32>
      %19 = arith.mulf %18, %17 : vector<16x32xf32>
      %cst_16 = arith.constant 0.707106769 : f32
      %20 = vector.broadcast %cst_16 : f32 to vector<16x32xf32>
      %21 = arith.mulf %17, %20 : vector<16x32xf32>
      %22 = math.erf %21 : vector<16x32xf32>
      %cst_17 = arith.constant 1.000000e+00 : f32
      %23 = vector.broadcast %cst_17 : f32 to vector<16x32xf32>
      %24 = arith.addf %23, %22 : vector<16x32xf32>
      %25 = arith.mulf %19, %24 : vector<16x32xf32>
      %c0_18 = arith.constant 0 : index
      %c0_19 = arith.constant 0 : index
      %26 = vector.load %arg5[%c0_18, %c0_19] : memref<1x32xf32, #tpu.memory_space<vmem>>, vector<1x32xf32>
      %c0_20 = arith.constant 0 : index
      %c0_21 = arith.constant 0 : index
      %27 = vector.load %arg6[%c0_20, %c0_21] : memref<1x32xf32, #tpu.memory_space<vmem>>, vector<1x32xf32>
      %cst_22 = arith.constant dense<0.000000e+00> : vector<16xf32>
      %28 = vector.multi_reduction <add>, %25, %cst_22 [1] : vector<16x32xf32> to vector<16xf32>
      %29 = vector.shape_cast %28 : vector<16xf32> to vector<16x1xf32>
      %cst_23 = arith.constant 3.200000e+01 : f32
      %30 = vector.broadcast %cst_23 : f32 to vector<16x1xf32>
      %31 = arith.divf %29, %30 : vector<16x1xf32>
      %32 = vector.broadcast %31 : vector<16x1xf32> to vector<16x32xf32>
      %33 = arith.subf %25, %32 : vector<16x32xf32>
      %34 = arith.mulf %33, %33 : vector<16x32xf32>
      %cst_24 = arith.constant dense<0.000000e+00> : vector<16xf32>
      %35 = vector.multi_reduction <add>, %34, %cst_24 [1] : vector<16x32xf32> to vector<16xf32>
      %36 = vector.shape_cast %35 : vector<16xf32> to vector<16x1xf32>
      %cst_25 = arith.constant 3.200000e+01 : f32
      %37 = vector.broadcast %cst_25 : f32 to vector<16x1xf32>
      %38 = arith.divf %36, %37 : vector<16x1xf32>
      %39 = vector.broadcast %31 : vector<16x1xf32> to vector<16x32xf32>
      %40 = arith.subf %25, %39 : vector<16x32xf32>
      %cst_26 = arith.constant 9.99999996E-13 : f32
      %41 = vector.broadcast %cst_26 : f32 to vector<16x1xf32>
      %42 = arith.addf %38, %41 : vector<16x1xf32>
      %43 = math.rsqrt %42 : vector<16x1xf32>
      %44 = vector.broadcast %43 : vector<16x1xf32> to vector<16x32xf32>
      %45 = arith.mulf %40, %44 : vector<16x32xf32>
      %46 = vector.broadcast %26 : vector<1x32xf32> to vector<16x32xf32>
      %47 = arith.mulf %45, %46 : vector<16x32xf32>
      %48 = vector.broadcast %27 : vector<1x32xf32> to vector<16x32xf32>
      %49 = arith.addf %47, %48 : vector<16x32xf32>
      %50 = arith.truncf %49 : vector<16x32xf32> to vector<16x32xbf16>
      %c0_27 = arith.constant 0 : index
      %c0_28 = arith.constant 0 : index
      %51 = vector.load %arg7[%c0_27, %c0_28] : memref<32x32xbf16, #tpu.memory_space<vmem>>, vector<32x32xbf16>
      %cst_29 = arith.constant dense<0.000000e+00> : vector<16x32xf32>
      %52 = tpu.matmul %50, %51, %cst_29 {dimension_numbers = #tpu.dot_dimension_numbers<[1], [0], [0], [1], [0, 0, 1, 1], [], []>} : vector<16x32xbf16>, vector<32x32xbf16>, vector<16x32xf32> -> vector<16x32xf32>
      %c0_30 = arith.constant 0 : index
      %c0_31 = arith.constant 0 : index
      %53 = vector.load %arg8[%c0_30, %c0_31] : memref<1x32xf32, #tpu.memory_space<vmem>>, vector<1x32xf32>
      %54 = vector.broadcast %53 : vector<1x32xf32> to vector<16x32xf32>
      %55 = arith.addf %52, %54 : vector<16x32xf32>
      %cst_32 = arith.constant 5.000000e-01 : f32
      %56 = vector.broadcast %cst_32 : f32 to vector<16x32xf32>
      %57 = arith.mulf %56, %55 : vector<16x32xf32>
      %cst_33 = arith.constant 0.707106769 : f32
      %58 = vector.broadcast %cst_33 : f32 to vector<16x32xf32>
      %59 = arith.mulf %55, %58 : vector<16x32xf32>
      %60 = math.erf %59 : vector<16x32xf32>
      %cst_34 = arith.constant 1.000000e+00 : f32
      %61 = vector.broadcast %cst_34 : f32 to vector<16x32xf32>
      %62 = arith.addf %61, %60 : vector<16x32xf32>
      %63 = arith.mulf %57, %62 : vector<16x32xf32>
      %c0_35 = arith.constant 0 : index
      %c0_36 = arith.constant 0 : index
      %64 = vector.load %arg9[%c0_35, %c0_36] : memref<1x32xf32, #tpu.memory_space<vmem>>, vector<1x32xf32>
      %c0_37 = arith.constant 0 : index
      %c0_38 = arith.constant 0 : index
      %65 = vector.load %arg10[%c0_37, %c0_38] : memref<1x32xf32, #tpu.memory_space<vmem>>, vector<1x32xf32>
      %cst_39 = arith.constant dense<0.000000e+00> : vector<16xf32>
      %66 = vector.multi_reduction <add>, %63, %cst_39 [1] : vector<16x32xf32> to vector<16xf32>
      %67 = vector.shape_cast %66 : vector<16xf32> to vector<16x1xf32>
      %cst_40 = arith.constant 3.200000e+01 : f32
      %68 = vector.broadcast %cst_40 : f32 to vector<16x1xf32>
      %69 = arith.divf %67, %68 : vector<16x1xf32>
      %70 = vector.broadcast %69 : vector<16x1xf32> to vector<16x32xf32>
      %71 = arith.subf %63, %70 : vector<16x32xf32>
      %72 = arith.mulf %71, %71 : vector<16x32xf32>
      %cst_41 = arith.constant dense<0.000000e+00> : vector<16xf32>
      %73 = vector.multi_reduction <add>, %72, %cst_41 [1] : vector<16x32xf32> to vector<16xf32>
      %74 = vector.shape_cast %73 : vector<16xf32> to vector<16x1xf32>
      %cst_42 = arith.constant 3.200000e+01 : f32
      %75 = vector.broadcast %cst_42 : f32 to vector<16x1xf32>
      %76 = arith.divf %74, %75 : vector<16x1xf32>
      %77 = vector.broadcast %69 : vector<16x1xf32> to vector<16x32xf32>
      %78 = arith.subf %63, %77 : vector<16x32xf32>
      %cst_43 = arith.constant 9.99999996E-13 : f32
      %79 = vector.broadcast %cst_43 : f32 to vector<16x1xf32>
      %80 = arith.addf %76, %79 : vector<16x1xf32>
      %81 = math.rsqrt %80 : vector<16x1xf32>
      %82 = vector.broadcast %81 : vector<16x1xf32> to vector<16x32xf32>
      %83 = arith.mulf %78, %82 : vector<16x32xf32>
      %84 = vector.broadcast %64 : vector<1x32xf32> to vector<16x32xf32>
      %85 = arith.mulf %83, %84 : vector<16x32xf32>
      %86 = vector.broadcast %65 : vector<1x32xf32> to vector<16x32xf32>
      %87 = arith.addf %85, %86 : vector<16x32xf32>
      %88 = arith.truncf %87 : vector<16x32xf32> to vector<16x32xbf16>
      %c0_44 = arith.constant 0 : index
      %c0_45 = arith.constant 0 : index
      %89 = vector.load %arg14[%c0_44, %c0_45] : memref<16x32xbf16, #tpu.memory_space<vmem>>, vector<16x32xbf16>
      tpu.vector_store %arg14[%c0_44, %c0_45], %88 {strides = array<i32>} : memref<16x32xbf16, #tpu.memory_space<vmem>>, vector<16x32xbf16>,
    } else {
    }
    %c0 = arith.constant 0 : index
    %c0_1 = arith.constant 0 : index
    %3 = vector.load %arg14[%c0, %c0_1] : memref<16x32xbf16, #tpu.memory_space<vmem>>, vector<16x32xbf16>
    %c0_2 = arith.constant 0 : index
    %c0_3 = arith.constant 0 : index
    %4 = vector.load %arg11[%c0_2, %c0_3] : memref<32x128xbf16, #tpu.memory_space<vmem>>, vector<32x128xbf16>
    %cst = arith.constant dense<0.000000e+00> : vector<16x128xf32>
    %5 = tpu.matmul %3, %4, %cst {dimension_numbers = #tpu.dot_dimension_numbers<[1], [0], [0], [1], [0, 0, 1, 1], [], []>} : vector<16x32xbf16>, vector<32x128xbf16>, vector<16x128xf32> -> vector<16x128xf32>
    %c0_4 = arith.constant 0 : index
    %c0_5 = arith.constant 0 : index
    %6 = vector.load %arg12[%c0_4, %c0_5] : memref<1x128xf32, #tpu.memory_space<vmem>>, vector<1x128xf32>
    %7 = vector.broadcast %6 : vector<1x128xf32> to vector<16x128xf32>
    %8 = arith.addf %5, %7 : vector<16x128xf32>
    %9 = arith.truncf %8 : vector<16x128xf32> to vector<16x128xbf16>
    %c0_6 = arith.constant 0 : index
    %c0_7 = arith.constant 0 : index
    %10 = vector.load %arg13[%c0_6, %c0_7] : memref<16x128xbf16, #tpu.memory_space<vmem>>, vector<16x128xbf16>
    tpu.vector_store %arg13[%c0_6, %c0_7], %9 {strides = array<i32>} : memref<16x128xbf16, #tpu.memory_space<vmem>>, vector<16x128xbf16>,
    return
  }
  func.func @transform_0(%arg0: i32, %arg1: i32) -> (i32, i32) {
    %c0_i32 = arith.constant 0 : i32
    %c0_i32_0 = arith.constant 0 : i32
    return %arg0, %c0_i32 : i32, i32
  }
  func.func @transform_1(%arg0: i32, %arg1: i32) -> (i32, i32) {
    %c0_i32 = arith.constant 0 : i32
    %c0_i32_0 = arith.constant 0 : i32
    %c0_i32_1 = arith.constant 0 : i32
    return %c0_i32, %c0_i32_0 : i32, i32
  }
  func.func @transform_2(%arg0: i32, %arg1: i32) -> (i32, i32) {
    %c0_i32 = arith.constant 0 : i32
    %c0_i32_0 = arith.constant 0 : i32
    %c0_i32_1 = arith.constant 0 : i32
    return %c0_i32, %c0_i32_0 : i32, i32
  }
  func.func @transform_3(%arg0: i32, %arg1: i32) -> (i32, i32) {
    %c0_i32 = arith.constant 0 : i32
    %c0_i32_0 = arith.constant 0 : i32
    %c0_i32_1 = arith.constant 0 : i32
    return %c0_i32, %c0_i32_0 : i32, i32
  }
  func.func @transform_4(%arg0: i32, %arg1: i32) -> (i32, i32) {
    %c0_i32 = arith.constant 0 : i32
    %c0_i32_0 = arith.constant 0 : i32
    %c0_i32_1 = arith.constant 0 : i32
    return %c0_i32, %c0_i32_0 : i32, i32
  }
  func.func @transform_5(%arg0: i32, %arg1: i32) -> (i32, i32) {
    %c0_i32 = arith.constant 0 : i32
    %c0_i32_0 = arith.constant 0 : i32
    %c0_i32_1 = arith.constant 0 : i32
    return %c0_i32, %c0_i32_0 : i32, i32
  }
  func.func @transform_6(%arg0: i32, %arg1: i32) -> (i32, i32) {
    %c0_i32 = arith.constant 0 : i32
    %c0_i32_0 = arith.constant 0 : i32
    %c0_i32_1 = arith.constant 0 : i32
    return %c0_i32, %c0_i32_0 : i32, i32
  }
  func.func @transform_7(%arg0: i32, %arg1: i32) -> (i32, i32) {
    %c0_i32 = arith.constant 0 : i32
    %c0_i32_0 = arith.constant 0 : i32
    %c0_i32_1 = arith.constant 0 : i32
    return %c0_i32, %c0_i32_0 : i32, i32
  }
  func.func @transform_8(%arg0: i32, %arg1: i32) -> (i32, i32) {
    %c0_i32 = arith.constant 0 : i32
    %c0_i32_0 = arith.constant 0 : i32
    %c0_i32_1 = arith.constant 0 : i32
    return %c0_i32, %c0_i32_0 : i32, i32
  }
  func.func @transform_9(%arg0: i32, %arg1: i32) -> (i32, i32) {
    %c0_i32 = arith.constant 0 : i32
    %c0_i32_0 = arith.constant 0 : i32
    return %c0_i32, %arg1 : i32, i32
  }
  func.func @transform_10(%arg0: i32, %arg1: i32) -> (i32, i32) {
    %c0_i32 = arith.constant 0 : i32
    %c0_i32_0 = arith.constant 0 : i32
    return %c0_i32, %arg1 : i32, i32
  }
  func.func @transform_11(%arg0: i32, %arg1: i32) -> (i32, i32) {
    %c0_i32 = arith.constant 0 : i32
    return %arg0, %arg1 : i32, i32
  }
}

module attributes {stable_mosaic.version = 11 : i64} {
  func.func @_lm_head_kernel(%arg0: i32, %arg1: i32, %arg2: memref<16x32xf32, #tpu.memory_space<vmem>>, %arg3: memref<32x32xbf16, #tpu.memory_space<vmem>>, %arg4: memref<1x32xf32, #tpu.memory_space<vmem>>, %arg5: memref<1x32xf32, #tpu.memory_space<vmem>>, %arg6: memref<1x32xf32, #tpu.memory_space<vmem>>, %arg7: memref<32x128xbf16, #tpu.memory_space<vmem>>, %arg8: memref<1x128xf32, #tpu.memory_space<vmem>>, %arg9: memref<16x128xbf16, #tpu.memory_space<vmem>>, %arg10: memref<16x32xbf16, #tpu.memory_space<vmem>>) attributes {dimension_semantics = [#tpu.dimension_semantics<parallel>, #tpu.dimension_semantics<arbitrary>], iteration_bounds = array<i64: 2, 2>, scalar_prefetch = 0 : i64, scratch_operands = 1 : i64, tpu.core_type = #tpu.core_type<tc>, window_params = [{transform_indices = @transform_0, window_bounds = array<i64: 16, 32>}, {pipeline_mode = #tpu.pipeline_mode<synchronous>, transform_indices = @transform_1, window_bounds = array<i64: 32, 32>}, {pipeline_mode = #tpu.pipeline_mode<synchronous>, transform_indices = @transform_2, window_bounds = array<i64: 1, 32>}, {pipeline_mode = #tpu.pipeline_mode<synchronous>, transform_indices = @transform_3, window_bounds = array<i64: 1, 32>}, {pipeline_mode = #tpu.pipeline_mode<synchronous>, transform_indices = @transform_4, window_bounds = array<i64: 1, 32>}, {transform_indices = @transform_5, window_bounds = array<i64: 32, 128>}, {transform_indices = @transform_6, window_bounds = array<i64: 1, 128>}, {transform_indices = @transform_7, window_bounds = array<i64: 16, 128>}]} {
    %c0_i32 = arith.constant 0 : i32
    %0 = arith.cmpi eq, %arg1, %c0_i32 : i32
    %1 = arith.extui %0 : i1 to i32
    %c0_i32_0 = arith.constant 0 : i32
    %2 = arith.cmpi ne, %1, %c0_i32_0 : i32
    scf.if %2 {
      %c0_8 = arith.constant 0 : index
      %c0_9 = arith.constant 0 : index
      %11 = vector.load %arg2[%c0_8, %c0_9] : memref<16x32xf32, #tpu.memory_space<vmem>>, vector<16x32xf32>
      %12 = arith.truncf %11 : vector<16x32xf32> to vector<16x32xbf16>
      %c0_10 = arith.constant 0 : index
      %c0_11 = arith.constant 0 : index
      %13 = vector.load %arg3[%c0_10, %c0_11] : memref<32x32xbf16, #tpu.memory_space<vmem>>, vector<32x32xbf16>
      %cst_12 = arith.constant dense<0.000000e+00> : vector<16x32xf32>
      %14 = tpu.matmul %12, %13, %cst_12 {dimension_numbers = #tpu.dot_dimension_numbers<[1], [0], [0], [1], [0, 0, 1, 1], [], []>} : vector<16x32xbf16>, vector<32x32xbf16>, vector<16x32xf32> -> vector<16x32xf32>
      %c0_13 = arith.constant 0 : index
      %c0_14 = arith.constant 0 : index
      %15 = vector.load %arg4[%c0_13, %c0_14] : memref<1x32xf32, #tpu.memory_space<vmem>>, vector<1x32xf32>
      %16 = vector.broadcast %15 : vector<1x32xf32> to vector<16x32xf32>
      %17 = arith.addf %14, %16 : vector<16x32xf32>
      %cst_15 = arith.constant 5.000000e-01 : f32
      %18 = vector.broadcast %cst_15 : f32 to vector<16x32xf32>
      %19 = arith.mulf %18, %17 : vector<16x32xf32>
      %cst_16 = arith.constant 0.707106769 : f32
      %20 = vector.broadcast %cst_16 : f32 to vector<16x32xf32>
      %21 = arith.mulf %17, %20 : vector<16x32xf32>
      %22 = math.erf %21 : vector<16x32xf32>
      %cst_17 = arith.constant 1.000000e+00 : f32
      %23 = vector.broadcast %cst_17 : f32 to vector<16x32xf32>
      %24 = arith.addf %23, %22 : vector<16x32xf32>
      %25 = arith.mulf %19, %24 : vector<16x32xf32>
      %c0_18 = arith.constant 0 : index
      %c0_19 = arith.constant 0 : index
      %26 = vector.load %arg5[%c0_18, %c0_19] : memref<1x32xf32, #tpu.memory_space<vmem>>, vector<1x32xf32>
      %c0_20 = arith.constant 0 : index
      %c0_21 = arith.constant 0 : index
      %27 = vector.load %arg6[%c0_20, %c0_21] : memref<1x32xf32, #tpu.memory_space<vmem>>, vector<1x32xf32>
      %cst_22 = arith.constant dense<0.000000e+00> : vector<16xf32>
      %28 = vector.multi_reduction <add>, %25, %cst_22 [1] : vector<16x32xf32> to vector<16xf32>
      %29 = vector.shape_cast %28 : vector<16xf32> to vector<16x1xf32>
      %cst_23 = arith.constant 3.200000e+01 : f32
      %30 = vector.broadcast %cst_23 : f32 to vector<16x1xf32>
      %31 = arith.divf %29, %30 : vector<16x1xf32>
      %32 = vector.broadcast %31 : vector<16x1xf32> to vector<16x32xf32>
      %33 = arith.subf %25, %32 : vector<16x32xf32>
      %34 = arith.mulf %33, %33 : vector<16x32xf32>
      %cst_24 = arith.constant dense<0.000000e+00> : vector<16xf32>
      %35 = vector.multi_reduction <add>, %34, %cst_24 [1] : vector<16x32xf32> to vector<16xf32>
      %36 = vector.shape_cast %35 : vector<16xf32> to vector<16x1xf32>
      %cst_25 = arith.constant 3.200000e+01 : f32
      %37 = vector.broadcast %cst_25 : f32 to vector<16x1xf32>
      %38 = arith.divf %36, %37 : vector<16x1xf32>
      %39 = vector.broadcast %31 : vector<16x1xf32> to vector<16x32xf32>
      %40 = arith.subf %25, %39 : vector<16x32xf32>
      %cst_26 = arith.constant 9.99999996E-13 : f32
      %41 = vector.broadcast %cst_26 : f32 to vector<16x1xf32>
      %42 = arith.addf %38, %41 : vector<16x1xf32>
      %43 = math.rsqrt %42 : vector<16x1xf32>
      %44 = vector.broadcast %43 : vector<16x1xf32> to vector<16x32xf32>
      %45 = arith.mulf %40, %44 : vector<16x32xf32>
      %46 = vector.broadcast %26 : vector<1x32xf32> to vector<16x32xf32>
      %47 = arith.mulf %45, %46 : vector<16x32xf32>
      %48 = vector.broadcast %27 : vector<1x32xf32> to vector<16x32xf32>
      %49 = arith.addf %47, %48 : vector<16x32xf32>
      %50 = arith.truncf %49 : vector<16x32xf32> to vector<16x32xbf16>
      %c0_27 = arith.constant 0 : index
      %c0_28 = arith.constant 0 : index
      %51 = vector.load %arg10[%c0_27, %c0_28] : memref<16x32xbf16, #tpu.memory_space<vmem>>, vector<16x32xbf16>
      tpu.vector_store %arg10[%c0_27, %c0_28], %50 {strides = array<i32>} : memref<16x32xbf16, #tpu.memory_space<vmem>>, vector<16x32xbf16>,
    } else {
    }
    %c0 = arith.constant 0 : index
    %c0_1 = arith.constant 0 : index
    %3 = vector.load %arg10[%c0, %c0_1] : memref<16x32xbf16, #tpu.memory_space<vmem>>, vector<16x32xbf16>
    %c0_2 = arith.constant 0 : index
    %c0_3 = arith.constant 0 : index
    %4 = vector.load %arg7[%c0_2, %c0_3] : memref<32x128xbf16, #tpu.memory_space<vmem>>, vector<32x128xbf16>
    %cst = arith.constant dense<0.000000e+00> : vector<16x128xf32>
    %5 = tpu.matmul %3, %4, %cst {dimension_numbers = #tpu.dot_dimension_numbers<[1], [0], [0], [1], [0, 0, 1, 1], [], []>} : vector<16x32xbf16>, vector<32x128xbf16>, vector<16x128xf32> -> vector<16x128xf32>
    %c0_4 = arith.constant 0 : index
    %c0_5 = arith.constant 0 : index
    %6 = vector.load %arg8[%c0_4, %c0_5] : memref<1x128xf32, #tpu.memory_space<vmem>>, vector<1x128xf32>
    %7 = vector.broadcast %6 : vector<1x128xf32> to vector<16x128xf32>
    %8 = arith.addf %5, %7 : vector<16x128xf32>
    %9 = arith.truncf %8 : vector<16x128xf32> to vector<16x128xbf16>
    %c0_6 = arith.constant 0 : index
    %c0_7 = arith.constant 0 : index
    %10 = vector.load %arg9[%c0_6, %c0_7] : memref<16x128xbf16, #tpu.memory_space<vmem>>, vector<16x128xbf16>
    tpu.vector_store %arg9[%c0_6, %c0_7], %9 {strides = array<i32>} : memref<16x128xbf16, #tpu.memory_space<vmem>>, vector<16x128xbf16>,
    return
  }
  func.func @transform_0(%arg0: i32, %arg1: i32) -> (i32, i32) {
    %c0_i32 = arith.constant 0 : i32
    %c0_i32_0 = arith.constant 0 : i32
    return %arg0, %c0_i32 : i32, i32
  }
  func.func @transform_1(%arg0: i32, %arg1: i32) -> (i32, i32) {
    %c0_i32 = arith.constant 0 : i32
    %c0_i32_0 = arith.constant 0 : i32
    %c0_i32_1 = arith.constant 0 : i32
    return %c0_i32, %c0_i32_0 : i32, i32
  }
  func.func @transform_2(%arg0: i32, %arg1: i32) -> (i32, i32) {
    %c0_i32 = arith.constant 0 : i32
    %c0_i32_0 = arith.constant 0 : i32
    %c0_i32_1 = arith.constant 0 : i32
    return %c0_i32, %c0_i32_0 : i32, i32
  }
  func.func @transform_3(%arg0: i32, %arg1: i32) -> (i32, i32) {
    %c0_i32 = arith.constant 0 : i32
    %c0_i32_0 = arith.constant 0 : i32
    %c0_i32_1 = arith.constant 0 : i32
    return %c0_i32, %c0_i32_0 : i32, i32
  }
  func.func @transform_4(%arg0: i32, %arg1: i32) -> (i32, i32) {
    %c0_i32 = arith.constant 0 : i32
    %c0_i32_0 = arith.constant 0 : i32
    %c0_i32_1 = arith.constant 0 : i32
    return %c0_i32, %c0_i32_0 : i32, i32
  }
  func.func @transform_5(%arg0: i32, %arg1: i32) -> (i32, i32) {
    %c0_i32 = arith.constant 0 : i32
    %c0_i32_0 = arith.constant 0 : i32
    return %c0_i32, %arg1 : i32, i32
  }
  func.func @transform_6(%arg0: i32, %arg1: i32) -> (i32, i32) {
    %c0_i32 = arith.constant 0 : i32
    %c0_i32_0 = arith.constant 0 : i32
    return %c0_i32, %arg1 : i32, i32
  }
  func.func @transform_7(%arg0: i32, %arg1: i32) -> (i32, i32) {
    %c0_i32 = arith.constant 0 : i32
    return %arg0, %arg1 : i32, i32
  }
}

</mosaic_0001>

<bundles_post_ra>
// kernel: bert_pretraining_heads.2
= control target key start
LH: loop header
LB: loop body
LE: loop exit
PB: predicated region body
PF: predicated region fallthrough
CT: control target
= control target key end

     0   :  { %s2033_s0 = inlined_call_operand.hbm [shape: f32[32,32], index: 0, kind: input, shape index: {}]   ;;  %s2034_s1 = inlined_call_operand.hbm [shape: bf16[32,32], index: 1, kind: input, shape index: {}]   ;;  %s2035_s2 = inlined_call_operand.hbm [shape: f32[1,32], index: 2, kind: input, shape index: {}]   ;;  %s2036_s3 = inlined_call_operand.hbm [shape: f32[1,32], index: 3, kind: input, shape index: {}]   ;;  %s2037_s4 = inlined_call_operand.hbm [shape: f32[1,32], index: 4, kind: input, shape index: {}]   ;;  %s2038_s5 = inlined_call_operand.hbm [shape: bf16[32,256], index: 5, kind: input, shape index: {}]   ;;  %s2039_s6 = inlined_call_operand.hbm [shape: f32[1,256], index: 6, kind: input, shape index: {}]   ;;  %s2040_s7 = inlined_call_operand.hbm [shape: bf16[32,256], index: 7, kind: output, shape index: {}]  }
   0x1   :  { %2073 = sst [smem:[#allocation32_spill]] %s2033_s0 }
   0x2   :  { %2074 = sst [smem:[#allocation33_spill]] %s2034_s1 }
   0x3   :  { %2075 = sst [smem:[#allocation34_spill]] %s2035_s2 }
   0x4   :  { %2076 = sst [smem:[#allocation35_spill]] %s2036_s3 }
   0x5   :  { %2077 = sst [smem:[#allocation36_spill]] %s2037_s4 }
   0x6   :  { %2078 = sst [smem:[#allocation37_spill]] %s2038_s5 }
   0x7   :  { %2079 = sst [smem:[#allocation38_spill]] %s2039_s6 }
   0x8   :  { %2080 = sst [smem:[#allocation39_spill]] %s2040_s7 }
   0x9   :  { %12 = vsyncpa [#allocation4], 0 }
   0xa   :  { %14 = vsyncpa [#allocation4 + $0x1], 0 }
   0xb   :  { %15 = vsyncpa [#allocation7], 0 }
   0xc   :  { %16 = vsyncpa [#allocation10], 0 }
   0xd   :  { %17 = vsyncpa [#allocation13], 0 }
   0xe   :  { %19 = vsyncpa [#allocation13 + $0x1], 0 }
   0xf   :  { %20 = vsyncpa [#allocation5], 0 }
  0x10   :  { %22 = vsyncpa [#allocation5 + $0x1], 0  ;;  %s1520_s24 = smov 0   ;;  %s1522_s25 = smov 0  }
  0x11   :  { %s1524_s26 = smov 0   ;;  %s1526_s27 = smov 0  }
  0x12   :  { %s1528_s28 = smov 0   ;;  %s1530_s29 = smov 0  }
  0x13   :  { %s1532_s30 = smov 0   ;;  %s1534_s8 = smov 0  }
  0x14   :  { %s1536_s9 = smov 0   ;;  %s1538_s10 = smov 0  }
  0x15   :  { %s1540_s11 = smov 0   ;;  %s1542_s12 = smov 0  }
  0x16   :  { %s1544_s13 = smov 0   ;;  %s1546_s14 = smov 0  }
  0x17 LB: > { %2081 = sst [smem:[#allocation21_spill]] %s1407_s24  ;;  %s1589_s15 = sadd.s32 4294967295, %s1459_s14   ;;  %s1459_s14 = sphi %s1546_s14, %s28_s14   ;;  %s1455_s13 = sphi %s1544_s13, %s2162_s13   ;;  %s1451_s12 = sphi %s1542_s12, %s2161_s12   ;;  %s1447_s11 = sphi %s1540_s11, %s2160_s11   ;;  %s1443_s10 = sphi %s1538_s10, %s2159_s10   ;;  %s1439_s9 = sphi %s1536_s9, %s2158_s9   ;;  %s1435_s8 = sphi %s1534_s8, %s2157_s8   ;;  %s1431_s30 = sphi %s1532_s30, %s2156_s30   ;;  %s1427_s29 = sphi %s1530_s29, %s2155_s29   ;;  %s1423_s28 = sphi %s1528_s28, %s2154_s28   ;;  %s1419_s27 = sphi %s1526_s27, %s2147_s27   ;;  %s1415_s26 = sphi %s1524_s26, %s2153_s26   ;;  %s1411_s25 = sphi %s1522_s25, %s2152_s25   ;;  %s1407_s24 = sphi %s1520_s24, %s2146_s24  }
  0x18   : > { %2082 = sst [smem:[#allocation22_spill]] %s1411_s25  ;;  %s828_s16 = sadd.s32 4294967294, %s1459_s14  }
  0x19   : > { %2083 = sst [smem:[#allocation23_spill]] %s1423_s28  ;;  %p2046_p0 = scmp.eq.s32.totalorder %s1589_s15, 0 }
  0x1a   : > { %2084 = sst [smem:[#allocation24_spill]] %s1443_s10  ;;  %p170_p1 = scmp.ne.s32.totalorder %s1423_s28, %s1419_s27 }
  0x1b   : > { %2085 = sst [smem:[#allocation25_spill]] %s1447_s11  ;;  %p221_p2 = scmp.ne.s32.totalorder %s1415_s26, %s1411_s25 }
  0x1c   : > { %p222_p3 = scmp.eq.s32.totalorder %s1589_s15, 3  ;;  %p1599_p4 = por %p170_p1, %p2046_p0 }
  0x1d   : > { %p227_p5 = scmp.ne.s32.totalorder %s1411_s25, %s1407_s24  ;;  %p228_p7 = scmp.eq.s32.totalorder %s828_s16, 3 }
  0x1e   : > { %s2086_s17 = scalar_select %p1599_p4, 1, 0 }
  0x1f   : > { %p1605_p6 = por %p222_p3, %p221_p2  ;;  %p829_p8 = scmp.ge.s32.totalorder %s1459_s14, 1 }
  0x20   : > { %2087 = sst [smem:[#allocation26_spill]] %s2086_s17  ;;  %p235_p9 = scmp.lt.s32.totalorder %s1459_s14, 5 }
  0x21   : > { %s2088_s18 = scalar_select %p1605_p6, 1, 0 }
  0x22   : > { %p1611_p10 = por %p228_p7, %p227_p5  ;;  %p1615_p11 = pnand %p829_p8, %p235_p9 }
  0x23   : > { %2089 = sst [smem:[#allocation27_spill]] %s2088_s18  ;;  %s1461_s21 = smov [#allocation6]  }
  0x24   : > { %s2090_s19 = scalar_select %p1611_p10, 1, 0 }
  0x25   : > { %s2092_s20 = scalar_select %p1615_p11, 1, 0 }
  0x26   : > { %2091 = sst [smem:[#allocation28_spill]] %s2090_s19  ;;  %s247_s22 = sshll.u32 %s1461_s21, 4  ;;  %s248_s22 = int_to_ptr.vmem [resolvable:$true] %s247_s22 }
  0x27   : > { %2093 = sst [smem:[#allocation29_spill]] %s2092_s20  ;;  %p923_p12 = pneg %p1615_p11 }
  0x28   : > { %s1462_s27 = smov [#allocation9]   ;;  %s2095_s1 = sld [smem:[#allocation33_spill]] }
  0x29   : > { %p1623_p13 = pnand %p923_p12, %p2046_p0  ;;  %s272_s16 = sshll.u32 %s1462_s27, 4  ;;  %s1627_s16 = int_to_ptr.vmem [resolvable:$true] %s272_s16 }
  0x2b   : > { %s2094_s23 = scalar_select %p1623_p13, 1, 0 }
  0x2c   : > { %p1637_p2 = pneg %p1623_p13 }
  0x2e   : > { %s1099_s7 = scalar_lea.hbm %s2095_s1, 256 }
  0x2f   : > { %p1100_p1 = scmp.ne.s32.totalorder %s2095_s1, %s1099_s7  ;;  %p1106_p7 = scmp.lt.u32.totalorder %s1099_s7, %s2095_s1 }
  0x31   : > { %p1102_p3 = pnand %p1637_p2, %p1100_p1 }
  0x33   : > { %p1103_p5 = pneg %p1102_p3 }
  0x35   : > { %p1108_p8 = pnand %p1106_p7, %p1103_p5 }
  0x37   : > { %1111 = shalt.err (!%p1108_p8)
}
  0x38   : > { %s1112_s24 = scalar_lea.vmem %s248_s22, 256  ;;  %p1120_p10 = scmp.lt.s32.totalorder %s248_s22, %s248_s22 }
  0x39   : > { %p1113_p9 = scmp.ne.s32.totalorder %s248_s22, %s1112_s24  ;;  %p1121_p6 = scmp.lt.s32.totalorder %s1112_s24, %s1112_s24 }
  0x3b   : > { %p1115_p12 = pnand %p1113_p9, %p1637_p2  ;;  %p1122_p4 = por %p1121_p6, %p1120_p10 }
  0x3d   : > { %p1116_p0 = pneg %p1115_p12 }
  0x3f   : > { %p1123_p11 = pnand %p1122_p4, %p1116_p0 }
  0x41   : > { %1126 = shalt.err (!%p1123_p11)
}
  0x42   : > { %s2058_s11 = smov 64   ;;  %s2059_s18 = smov 4  }
  0x43   : > { %926 = dma.hbm_to_vmem [thread:$0]  (!%p1623_p13), %s2095_s1, 256, %s248_s22, [#allocation7], %s2058_s11, %s2058_s11, %s2059_s18  }
  0x44   : > { %s2097_s3 = sld [smem:[#allocation35_spill]] }
  0x4a   : > { %s1127_s25 = scalar_lea.hbm %s2097_s3, 16 }
  0x4b   : > { %p1128_p0 = scmp.ne.s32.totalorder %s2097_s3, %s1127_s25  ;;  %p1134_p10 = scmp.lt.u32.totalorder %s1127_s25, %s2097_s3 }
  0x4d   : > { %p1130_p4 = pnand %p1128_p0, %p1637_p2 }
  0x4f   : > { %p1131_p6 = pneg %p1130_p4 }
  0x51   : > { %p1136_p11 = pnand %p1134_p10, %p1131_p6 }
  0x53   : > { %1139 = shalt.err (!%p1136_p11)
}
  0x54   : > { %s1140_s22 = scalar_lea.vmem %s1627_s16, 16  ;;  %s1147_s17 = scalar_lea.vmem %s1627_s16, 32 }
  0x55   : > { %p1141_p1 = scmp.ne.s32.totalorder %s1627_s16, %s1140_s22  ;;  %p1148_p7 = scmp.lt.s32.totalorder %s1627_s16, %s1627_s16 }
  0x56   : > { %p1149_p8 = scmp.lt.s32.totalorder %s1147_s17, %s1140_s22 }
  0x57   : > { %p1143_p3 = pnand %p1141_p1, %p1637_p2 }
  0x58   : > { %p1150_p9 = por %p1149_p8, %p1148_p7 }
  0x59   : > { %p1144_p5 = pneg %p1143_p3 }
  0x5b   : > { %p1151_p12 = pnand %p1150_p9, %p1144_p5 }
  0x5d   : > { %1154 = shalt.err (!%p1151_p12)
}
  0x5e   : > { %932 = dma.hbm_to_vmem [thread:$0]  (!%p1623_p13), %s2097_s3, 16, %s1627_s16, [#allocation10]  }
  0x5f   : > { %p2061_p0 = scmp.eq.s32.totalorder %s1459_s14, 0  ;;  %s2056_s20 = sadd.s32 1, %s1451_s12 }
  0x60   : > { %p1685_p4 = scmp.ge.s32.totalorder %s2056_s20, 2  ;;  %p164_p6 = scmp.ne.s32.totalorder %s1427_s29, %s1423_s28 }
  0x61   : > { %p2060_p10 = scmp.lt.s32.totalorder %s1459_s14, 4  ;;  %s315_s19 = sand.u32 1, %s1459_s14  }
  0x62   : > { %s2098_s10 = scalar_select %p1685_p4, 1, 0 }
  0x63   : > { %p166_p11 = por %p164_p6, %p2061_p0  ;;  %s2057_s27 = sand.u32 1, %s1427_s29  }
  0x64   : > { %s838_s24 = sshll.u32 %s2057_s27, 4  ;;  %s839_s22 = sshll.u32 %s1451_s12, 6 }
  0x65   : > { %s2099_s5 = sld [smem:[#allocation37_spill]]  ;;  %s319_s25 = scalar_lea.vmem [#allocation12], %s838_s24 }
  0x66   : > { %s325_s7 = sshll.u32 %s319_s25, 4  ;;  %p1706_p1 = pnand %p2060_p10, %p166_p11  ;;  %s1710_s7 = int_to_ptr.vmem [resolvable:$true] %s325_s7 }
  0x67   : > { %s1465_s27 = smov [#allocation8]  }
  0x68   : > { %s2100_s20 = scalar_select %p1706_p1, 1, 0 }
  0x69   : > { %s1712_s11 = sshll.u32 %s1465_s27, 4  ;;  %p2066_p5 = pneg %p1706_p1  ;;  %s262_s11 = int_to_ptr.vmem [resolvable:$true] %s1712_s11 }
  0x6b   : > { %s1702_s16 = scalar_lea.hbm %s2099_s5, %s839_s22  ;;  %s1714_s22 = scalar_lea.sflag [#allocation13], %s315_s19 }
  0x6c   : > { %s1155_s17 = scalar_lea.hbm %s1702_s16, 256  ;;  %s1160_s25 = scalar_lea.hbm %s2099_s5, 512 }
  0x6d   : > { %p1156_p3 = scmp.ne.s32.totalorder %s1702_s16, %s1155_s17  ;;  %p1161_p9 = scmp.lt.u32.totalorder %s1702_s16, %s2099_s5 }
  0x6e   : > { %p1162_p12 = scmp.lt.u32.totalorder %s1160_s25, %s1155_s17  ;;  %p1164_p11 = scmp.lt.u32.totalorder %s1155_s17, %s1702_s16 }
  0x6f   : > { %p1158_p7 = pnand %p2066_p5, %p1156_p3 }
  0x70   : > { %p1163_p6 = por %p1162_p12, %p1161_p9 }
  0x71   : > { %p1159_p8 = pneg %p1158_p7 }
  0x72   : > { %p1165_p10 = por %p1164_p11, %p1163_p6 }
  0x74   : > { %p1166_p0 = pnand %p1165_p10, %p1159_p8 }
  0x76   : > { %1169 = shalt.err (!%p1166_p0)
}
  0x77   : > { %s1170_s19 = scalar_lea.vmem %s1710_s7, 256  ;;  %s1466_s27 = smov [#allocation12]  }
  0x78   : > { %p1171_p3 = scmp.ne.s32.totalorder %s1710_s7, %s1170_s19  ;;  %s1175_s24 = sshll.u32 %s1466_s27, 4  ;;  %s1176_s24 = int_to_ptr.vmem [resolvable:$false] %s1175_s24 }
  0x79   : > { %s1177_s1 = scalar_lea.vmem %s1176_s24, 512  ;;  %p1178_p13 = scmp.lt.s32.totalorder %s1710_s7, %s1176_s24 }
  0x7a   : > { %p1173_p7 = pnand %p1171_p3, %p2066_p5  ;;  %p1179_p9 = scmp.lt.s32.totalorder %s1177_s1, %s1170_s19 }
  0x7c   : > { %p1174_p4 = pneg %p1173_p7  ;;  %p1180_p12 = por %p1179_p9, %p1178_p13 }
  0x7e   : > { %p1181_p6 = pnand %p1180_p12, %p1174_p4 }
  0x80   : > { %1184 = shalt.err (!%p1181_p6)
}
  0x81   : > { %s2069_s18 = smov 128   ;;  %s2101_s17 = smov 4  }
  0x82   : > { %s2102_s6 = smov 64   ;;  %s2103_s2 = sld [smem:[#allocation34_spill]] }
  0x83   : > { %942 = dma.hbm_to_vmem [thread:$0]  (!%p1706_p1), %s1702_s16, 256, %s1710_s7, %s1714_s22, %s2069_s18, %s2102_s6, %s2101_s17  }
  0x88   : > { %s1185_s19 = scalar_lea.hbm %s2103_s2, 16 }
  0x89   : > { %p1186_p13 = scmp.ne.s32.totalorder %s2103_s2, %s1185_s19  ;;  %p1192_p10 = scmp.lt.u32.totalorder %s1185_s19, %s2103_s2 }
  0x8b   : > { %p1188_p0 = pnand %p1186_p13, %p1637_p2 }
  0x8d   : > { %p1189_p4 = pneg %p1188_p0 }
  0x8f   : > { %p1194_p8 = pnand %p1192_p10, %p1189_p4 }
  0x91   : > { %1197 = shalt.err (!%p1194_p8)
}
  0x92   : > { %s1198_s28 = scalar_lea.vmem %s262_s11, 16  ;;  %s1205_s7 = scalar_lea.vmem %s262_s11, 32 }
  0x93   : > { %p1199_p11 = scmp.ne.s32.totalorder %s262_s11, %s1198_s28  ;;  %p1206_p9 = scmp.lt.s32.totalorder %s262_s11, %s262_s11 }
  0x94   : > { %p1207_p12 = scmp.lt.s32.totalorder %s1205_s7, %s1198_s28 }
  0x95   : > { %p1201_p3 = pnand %p1199_p11, %p1637_p2 }
  0x96   : > { %p1208_p6 = por %p1207_p12, %p1206_p9 }
  0x97   : > { %p1202_p7 = pneg %p1201_p3 }
  0x99   : > { %p1209_p5 = pnand %p1208_p6, %p1202_p7 }
  0x9b   : > { %1212 = shalt.err (!%p1209_p5)
}
  0x9c   : > { %p2104_p13 = scmp.ne.s32.totalorder %s2094_s23, 0  ;;  %s1468_s3 = smov [#allocation11]  }
  0x9d   : > { %s283_s5 = sshll.u32 %s1468_s3, 4  ;;  %s2105_s4 = sld [smem:[#allocation36_spill]]  ;;  %s284_s5 = int_to_ptr.vmem [resolvable:$true] %s283_s5 }
  0x9e   : > { %929 = dma.hbm_to_vmem [thread:$0]  (!%p2104_p13), %s2103_s2, 16, %s262_s11, [#allocation7]  }
  0xa3   : > { %s1213_s27 = scalar_lea.hbm %s2105_s4, 16 }
  0xa4   : > { %p1214_p0 = scmp.ne.s32.totalorder %s2105_s4, %s1213_s27  ;;  %p1220_p10 = scmp.lt.u32.totalorder %s1213_s27, %s2105_s4 }
  0xa6   : > { %p1216_p5 = pnand %p1214_p0, %p1637_p2 }
  0xa8   : > { %p1217_p4 = pneg %p1216_p5 }
  0xaa   : > { %p1222_p8 = pnand %p1220_p10, %p1217_p4 }
  0xac   : > { %1225 = shalt.err (!%p1222_p8)
}
  0xad   : > { %s1226_s11 = scalar_lea.vmem %s284_s5, 16  ;;  %s1233_s7 = scalar_lea.vmem %s284_s5, 32 }
  0xae   : > { %p1227_p11 = scmp.ne.s32.totalorder %s284_s5, %s1226_s11  ;;  %p1234_p9 = scmp.lt.s32.totalorder %s284_s5, %s284_s5 }
  0xaf   : > { %p1235_p12 = scmp.lt.s32.totalorder %s1233_s7, %s1226_s11 }
  0xb0   : > { %p1229_p3 = pnand %p1227_p11, %p1637_p2 }
  0xb1   : > { %p1236_p6 = por %p1235_p12, %p1234_p9 }
  0xb2   : > { %p1230_p7 = pneg %p1229_p3 }
  0xb4   : > { %p1237_p1 = pnand %p1236_p6, %p1230_p7 }
  0xb6   : > { %1240 = shalt.err (!%p1237_p1)
}
  0xb7   : > { %935 = dma.hbm_to_vmem [thread:$0]  (!%p2104_p13), %s2105_s4, 16, %s284_s5, [#allocation10]  }
  0xb8   : > { %s2106_s23 = sadd.s32 1, %s1451_s12  ;;  %p2107_p2 = scmp.ne.s32.totalorder %s2098_s10, 0 }
  0xb9   : > { %s40_s21 = sadd.s32 1, %s1455_s13  ;;  %s47_s3 = sadd.s32 1, %s1439_s9 }
  0xba   : > { %s2164_s23 = smov (%p2107_p2, %s2106_s23), 0  ;;  %s2166_s21 = smov (!%p2107_p2, %s40_s21), %s1455_s13 }
  0xbb   : > { %2108 = sst [smem:[#allocation30_spill]] %s2164_s23  ;;  %p54_p1 = scmp.ne.s32.totalorder %s1439_s9, %s1435_s8 }
  0xbc   : > { %p60_p0 = scmp.ne.s32.totalorder %s1435_s8, %s1431_s30  ;;  %p42_p5 = scmp.ge.s32.totalorder %s2166_s21, 2 }
  0xbd   : > { %s154_s6 = ssub.s32 %s1451_s12, %s2164_s23  ;;  %p2109_p4 = scmp.eq.s32.totalorder %s1459_s14, 0 }
  0xbe   : > { %p2111_p10 = scmp.eq.s32.totalorder %s1589_s15, 0  ;;  %s2168_s21 = smov (%p42_p5, %s2166_s21), 0 }
  0xbf   : > { %p1801_p13 = por %p2109_p4, %p54_p1  ;;  %2113 = sst [smem:[#allocation31_spill]] %s2168_s21 }
  0xc0   : > { %p1807_p8 = por %p2111_p10, %p60_p0  ;;  %p155_p11 = scmp.eq.s32.totalorder %s154_s6, 0 }
  0xc1   : > { %s211_s30 = sadd.s32 1, %s1415_s26  ;;  %s44_s10 = ssub.s32 %s1455_s13, %s2168_s21 }
  0xc2   : > { %s2112_s25 = scalar_select %p1807_p8, 1, 0 }
  0xc3   : > { %s294_s27 = sand.u32 1, %s1439_s9   ;;  %p45_p3 = scmp.eq.s32.totalorder %s44_s10, 0 }
  0xc4   : > { %s208_s19 = sor.u32 %s154_s6, %s44_s10  ;;  %s2114_s24 = sadd.s32 1, %s1427_s29 }
  0xc5   : > { %s1820_s28 = scalar_select %p155_p11, %s1427_s29, %s2114_s24  }
  0xc6   : > { %s1823_s1 = scalar_select %p45_p3, %s1439_s9, %s47_s3  }
  0xc7   : > { %p209_p7 = scmp.eq.s32.totalorder %s208_s19, 0  ;;  %s835_s11 = sshll.u32 %s294_s27, 4 }
  0xc8   : > { %s868_s7 = sshll.u32 %s1455_s13, 8  ;;  %s2115_s0 = sld [smem:[#allocation32_spill]] }
  0xc9   : > { %s1827_s16 = scalar_select %p209_p7, %s1415_s26, %s211_s30  }
  0xca   : > { %s298_s6 = scalar_lea.vmem [#allocation3], %s835_s11  ;;  %p2116_p9 = scmp.lt.s32.totalorder %s1459_s14, 4 }
  0xcb   : > { %s305_s10 = sshll.u32 %s298_s6, 4  ;;  %s1844_s30 = scalar_lea.sflag [#allocation4], %s294_s27  ;;  %s1842_s10 = int_to_ptr.vmem [resolvable:$true] %s305_s10 }
  0xcc   : > { %p1838_p12 = pnand %p2116_p9, %p1801_p13 }
  0xce   : > { %s1832_s2 = scalar_lea.hbm %s2115_s0, %s868_s7  ;;  %p1243_p2 = pneg %p1838_p12 }
  0xcf   : > { %s1241_s18 = scalar_lea.hbm %s1832_s2, 256  ;;  %s1246_s24 = scalar_lea.hbm %s2115_s0, 512 }
  0xd0   : > { %p1242_p6 = scmp.ne.s32.totalorder %s1832_s2, %s1241_s18  ;;  %p1247_p5 = scmp.lt.u32.totalorder %s1832_s2, %s2115_s0 }
  0xd1   : > { %p1248_p4 = scmp.lt.u32.totalorder %s1246_s24, %s1241_s18  ;;  %p1250_p10 = scmp.lt.u32.totalorder %s1241_s18, %s1832_s2 }
  0xd2   : > { %p1244_p1 = pnand %p1243_p2, %p1242_p6 }
  0xd3   : > { %p1249_p13 = por %p1248_p4, %p1247_p5 }
  0xd4   : > { %p1245_p0 = pneg %p1244_p1 }
  0xd5   : > { %p1251_p11 = por %p1250_p10, %p1249_p13 }
  0xd7   : > { %p1252_p3 = pnand %p1251_p11, %p1245_p0 }
  0xd9   : > { %1255 = shalt.err (!%p1252_p3)
}
  0xda   : > { %s1256_s27 = scalar_lea.vmem %s1842_s10, 256  ;;  %s1469_s17 = smov [#allocation3]  }
  0xdb   : > { %p1257_p7 = scmp.ne.s32.totalorder %s1842_s10, %s1256_s27  ;;  %s1261_s6 = sshll.u32 %s1469_s17, 4  ;;  %s1262_s6 = int_to_ptr.vmem [resolvable:$false] %s1261_s6 }
  0xdc   : > { %s1263_s5 = scalar_lea.vmem %s1262_s6, 512  ;;  %p1264_p1 = scmp.lt.s32.totalorder %s1842_s10, %s1262_s6 }
  0xdd   : > { %p1259_p9 = pnand %p1257_p7, %p1243_p2  ;;  %p1265_p5 = scmp.lt.s32.totalorder %s1263_s5, %s1256_s27 }
  0xdf   : > { %p1260_p6 = pneg %p1259_p9  ;;  %p1266_p4 = por %p1265_p5, %p1264_p1 }
  0xe1   : > { %p1267_p13 = pnand %p1266_p4, %p1260_p6 }
  0xe3   : > { %1270 = shalt.err (!%p1267_p13)
}
  0xe4   : > { %s1470_s18 = smov 8   ;;  %s2118_s19 = smov 128  }
  0xe5   : > { %939 = dma.hbm_to_vmem [thread:$0]  (!%p1838_p12), %s1832_s2, 256, %s1842_s10, %s1844_s30, %s2118_s19, %s2118_s19, %s1470_s18  }
  0xe6   : > { %s840_s24 = sshll.u32 %s1451_s12, 4  ;;  %s2119_s11 = sand.u32 1, %s1427_s29  }
  0xe7   : > { %s338_s7 = scalar_lea.vmem [#allocation14], %s2119_s11  ;;  %s2120_s5 = sld [smem:[#allocation38_spill]] }
  0xe8   : > { %s345_s17 = sshll.u32 %s338_s7, 4  ;;  %p2121_p0 = scmp.ne.s32.totalorder %s2100_s20, 0  ;;  %s346_s17 = int_to_ptr.vmem [resolvable:$true] %s345_s17 }
  0xea   : > { %p2122_p10 = pneg %p2121_p0 }
  0xed   : > { %s343_s0 = scalar_lea.hbm %s2120_s5, %s840_s24  ;;  %s1276_s23 = scalar_lea.hbm %s2120_s5, 32 }
  0xee   : > { %s1271_s4 = scalar_lea.hbm %s343_s0, 16  ;;  %p1277_p12 = scmp.lt.u32.totalorder %s343_s0, %s2120_s5 }
  0xef   : > { %p1272_p2 = scmp.ne.s32.totalorder %s343_s0, %s1271_s4  ;;  %p1278_p7 = scmp.lt.u32.totalorder %s1276_s23, %s1271_s4 }
  0xf0   : > { %p1280_p6 = scmp.lt.u32.totalorder %s1271_s4, %s343_s0 }
  0xf1   : > { %p1274_p11 = pnand %p1272_p2, %p2122_p10  ;;  %p1279_p9 = por %p1278_p7, %p1277_p12 }
  0xf3   : > { %p1275_p3 = pneg %p1274_p11  ;;  %p1281_p1 = por %p1280_p6, %p1279_p9 }
  0xf5   : > { %p1282_p5 = pnand %p1281_p1, %p1275_p3 }
  0xf7   : > { %1285 = shalt.err (!%p1282_p5)
}
  0xf8   : > { %s1286_s30 = scalar_lea.vmem %s346_s17, 16  ;;  %p2123_p13 = pmov %p2122_p10 }
  0xf9   : > { %p1287_p4 = scmp.ne.s32.totalorder %s346_s17, %s1286_s30  ;;  %s1471_s18 = smov [#allocation14]  }
  0xfa   : > { %s1291_s21 = sshll.u32 %s1471_s18, 4  ;;  %s1292_s21 = int_to_ptr.vmem [resolvable:$false] %s1291_s21 }
  0xfb   : > { %p1289_p2 = pnand %p1287_p4, %p2123_p13  ;;  %s1293_s19 = scalar_lea.vmem %s1292_s21, 32 }
  0xfc   : > { %p1294_p11 = scmp.lt.s32.totalorder %s346_s17, %s1292_s21  ;;  %p1295_p8 = scmp.lt.s32.totalorder %s1293_s19, %s1286_s30 }
  0xfd   : > { %p1290_p10 = pneg %p1289_p2 }
  0xfe   : > { %p1296_p7 = por %p1295_p8, %p1294_p11 }
 0x100   : > { %p1297_p12 = pnand %p1296_p7, %p1290_p10 }
 0x102   : > { %1300 = shalt.err (!%p1297_p12)
}
 0x103   : > { %945 = dma.hbm_to_vmem [thread:$0]  (!%p2121_p0), %s343_s0, 16, %s346_s17, %s1714_s22  }
 0x104   : > { %s2124_s4 = sld [smem:[#allocation29_spill]] }
 0x10a   : > { %p2125_p3 = scmp.ne.s32.totalorder %s2124_s4, 0 }
 0x10b   : > { %s356_s23 = sand.u32 (!%p2125_p3), 1, %s1435_s8   ;;  %p2126_p9 = scmp.ne.s32.totalorder (!%p2125_p3), %s2112_s25, 0 }
 0x10c   : > { %354 = sbr.rel (%p2125_p3) target bundleno = 1104 (0x450), region = 48  ;;  %s1898_s24 = sshll.u32 (!%p2125_p3), %s356_s23, 4 }
 0x10d   : > { %s357_s11 = scalar_lea.sflag (!%p2125_p3), [#allocation4], %s356_s23  ;;  %s360_s7 = scalar_lea.vmem (!%p2125_p3), [#allocation3], %s1898_s24 }
 0x113   : > { %1386 = dma.done.wait (%p2126_p9), %s357_s11, 256  }
 0x114   : > { %1388 = vsyncadd (%p2126_p9), %s357_s11, 4294967040  ;;  %p2127_p8 = scmp.eq.s32.totalorder %s1589_s15, 0 }
 0x116   : > { %1390 = dma.done.wait (%p2127_p8), [#allocation7], 272   ;;  %p2128_p0 = pmov %p2127_p8 }
 0x118   : > { %1392 = vsyncadd (%p2128_p0), [#allocation7], 4294967024  ;;  %p2129_p6 = pmov %p2128_p0 }
 0x119   : > { %p2130_p1 = pmov %p2128_p0 }
 0x11a   : > { %1394 = dma.done.wait (%p2129_p6), [#allocation10], 32  }
 0x11b   : > { %1396 = vsyncadd (%p2130_p1), [#allocation10], 4294967264  ;;  %s2131_s0 = sld [smem:[#allocation23_spill]]  ;;  %s2132_s20 = sld [smem:[#allocation26_spill]] }
 0x11c   : > { %s381_s22 = sand.u32 1, %s1589_s15  }
 0x11d   : > { %s382_s25 = scalar_lea.sflag [#allocation13], %s381_s22 }
 0x121   : > { %s383_s17 = sand.u32 1, %s2131_s0   ;;  %p2133_p5 = scmp.ne.s32.totalorder %s2132_s20, 0 }
 0x122   : > { %s1915_s27 = sshll.u32 %s383_s17, 4 }
 0x123   : > { %s385_s6 = scalar_lea.vmem [#allocation12], %s1915_s27 }
 0x124   : > { %1398 = dma.done.wait (%p2133_p5), %s382_s25, 272  }
 0x125   : > { %1400 = vsyncadd (%p2133_p5), %s382_s25, 4294967024  ;;  %s2134_s3 = sld [smem:[#allocation22_spill]]  ;;  %s1927_s30 = scalar_lea.vmem [#allocation14], %s383_s17 }
 0x126   : > { %s2135_s18 = sld [smem:[#allocation24_spill]] }
 0x12b   : > { %s430_s2 = sand.u32 1, %s2134_s3  }
 0x12c   : > { %s1925_s10 = sshll.u32 %s430_s2, 3  ;;  %p849_p4 = scmp.ne.s32.totalorder %s2135_s18, 0 }
 0x12d   : > { %s432_s15 = scalar_lea.vmem [#allocation15], %s1925_s10  ;;  %v1087_v0 = vld [vmem:[#allocation6] sm:$0xff] (!%p849_p4)   ;;  %v1472_v1 = vmov (!%p849_p4), 0.0   ;;  %v1088_v2 = vld [vmem:[#allocation6 + $0x8] sm:$0xff] (!%p849_p4)   ;;  %vm1473_vm0 = vmmov (!%p849_p4), 0   ;;  %vm466_vm1 = vcmask (!%p849_p4), 261120  }
 0x12e   : > { %439 = sbr.rel (%p849_p4) target bundleno = 861 (0x35d), region = 80  ;;  %883 = vmatprep.subr.bf16.mxu0 (!%p849_p4), %v1472_v1  ;;  %887 = vmatprep.mubr.msk.bf16.mxu0 (!%p849_p4), %vm1473_vm0, %v1472_v1  ;;  %v440_v3 = vld [vmem:[%s360_s7] sm:$0xff] (!%p849_p4)  ;;  %v441_v4 = vld [vmem:[%s360_s7 + $0x8] sm:$0xff] (!%p849_p4) }
 0x12f   : > { %884 = vmatpush3.bf16.msra.mxu0 (!%p849_p4), %v1087_v0  ;;  %v442_v5 = vpack.c.bf16 (!%p849_p4), %v441_v4, %v440_v3  ;;  %v850_v6 = vld [vmem:[#allocation8] ss:$0 sm:$0xff] (!%p849_p4)  ;;  %v854_v43 = vld [vmem:[#allocation9] ss:$0 sm:$0xff] (!%p849_p4)  ;;  %v855_v47 = vld [vmem:[#allocation11] ss:$0 sm:$0xff] (!%p849_p4) }
 0x130   : > { %885 = vmatprep.subr.bf16.mxu0 (!%p849_p4), %v1472_v1 }
 0x133   : > { %886 = vmatpush3.bf16.msra.mxu0 (!%p849_p4), %v1088_v2 }
 0x136   : > { %888 = vmatmul.mubr.msk.bf16.vlgmr.msra.gmra.mrb[0].mxu0 %vm466_vm1, %v442_v5 }
 0x209   : > { %v504_v7 = vpop.f32.mrb[0].mxu0 }
 0x20a   : > { %v505_v8 = vadd.f32 %v850_v6, %v504_v7  ;;  %v889_v9 = vpop.f32.mrb[1].mxu0 }
 0x20b   : > { %v507_v10 = vpop.f32.mrb[2].mxu0 }
 0x20c   : > { %v513_v11 = vmul.f32 0.70710677, %v505_v8  ;;  %v508_v12 = vadd.f32 %v850_v6, %v507_v10  ;;  %v890_v13 = vpop.f32.mrb[3].mxu0  ;;  %v511_v16 = vmul.f32 0.5, %v505_v8 }
 0x20e   : > { %1089 = verf.f32 %v513_v11  ;;  %v514_v14 = vmul.f32 0.70710677, %v508_v12  ;;  %v512_v19 = vmul.f32 0.5, %v508_v12 }
 0x210   : > { %1091 = verf.f32 %v514_v14 }
 0x218   : > { %v1090_v15 = vpop.eup %1089 }
 0x219   : > { %v517_v17 = vadd.f32 1.0, %v1090_v15 }
 0x21a   : > { %v1092_v18 = vpop.eup %1091 }
 0x21b   : > { %v519_v20 = vmul.f32 %v517_v17, %v511_v16  ;;  %v518_v21 = vadd.f32 1.0, %v1092_v18 }
 0x21d   : > { %v523_v22 = vsel %vm466_vm1, %v519_v20, 0.0  ;;  %v520_v23 = vmul.f32 %v518_v21, %v512_v19 }
 0x21e   : > { %524 = vadd.xlane.f32.xlu0 %v523_v22 }
 0x21f   : > { %v526_v24 = vsel %vm466_vm1, %v520_v23, 0.0 }
 0x222   : > { %527 = vadd.xlane.f32.xlu0 %v526_v24 }
 0x2ab   : > { %v525_v25 = vpop.xlane.xlu0 %524 }
 0x2ac   : > { %v530_v26 = vmul.f32 0.03125, %v525_v25 }
 0x2ae   : > { %v532_v27 = vsub.f32 %v519_v20, %v530_v26 }
 0x2af   : > { %v528_v28 = vpop.xlane.xlu0 %527 }
 0x2b0   : > { %v531_v29 = vmul.f32 0.03125, %v528_v28  ;;  %v534_v30 = vmul.f32 %v532_v27, %v532_v27 }
 0x2b2   : > { %v533_v31 = vsub.f32 %v520_v23, %v531_v29  ;;  %v536_v32 = vsel %vm466_vm1, %v534_v30, 0.0 }
 0x2b3   : > { %537 = vadd.xlane.f32.xlu1 %v536_v32 }
 0x2b4   : > { %v535_v33 = vmul.f32 %v533_v31, %v533_v31 }
 0x2b6   : > { %v539_v34 = vsel %vm466_vm1, %v535_v33, 0.0 }
 0x2b7   : > { %540 = vadd.xlane.f32.xlu1 %v539_v34 }
 0x340   : > { %v538_v35 = vpop.xlane.xlu1 %537 }
 0x341   : > { %v542_v36 = vmul.f32 0.03125, %v538_v35 }
 0x343   : > { %v544_v37 = vadd.f32 1e-12, %v542_v36 }
 0x344   : > { %v541_v38 = vpop.xlane.xlu1 %540 }
 0x345   : > { %1093 = vrsqrt.f32 %v544_v37  ;;  %v543_v39 = vmul.f32 0.03125, %v541_v38 }
 0x347   : > { %v545_v40 = vadd.f32 1e-12, %v543_v39 }
 0x349   : > { %1095 = vrsqrt.f32 %v545_v40 }
 0x34f   : > { %v1094_v41 = vpop.eup %1093 }
 0x350   : > { %v548_v42 = vmul.f32 %v1094_v41, %v532_v27 }
 0x352   : > { %v556_v45 = vmul.f32 %v854_v43, %v548_v42 }
 0x353   : > { %v1096_v44 = vpop.eup %1095 }
 0x354   : > { %v549_v46 = vmul.f32 %v1096_v44, %v533_v31  ;;  %v564_v49 = vadd.f32 %v855_v47, %v556_v45 }
 0x356   : > { %v557_v48 = vmul.f32 %v854_v43, %v549_v46 }
 0x358   : > { %v565_v50 = vadd.f32 %v855_v47, %v557_v48 }
 0x35a   : > { %v566_v51 = vpack.c.bf16 %v565_v50, %v564_v49 }
 0x35c   : > { %567 = vst.msk [vmem:[#allocation2] sm:$0xff] %vm466_vm1, %v566_v51 }
 0x35d PF: > { %s2136_s21 = sld [smem:[#allocation25_spill]]  ;;  %s2137_s19 = sld [smem:[#allocation24_spill]]  ;;  %v1097_v52 = vld [vmem:[%s385_s6] sm:$0xff]   ;;  %v1474_v53 = vmov 0.0   ;;  %v1098_v54 = vld [vmem:[%s385_s6 + $0x8] sm:$0xff]   ;;  %vm1475_vm2 = vmmov 0  }
 0x35e   : > { %891 = vmatprep.subr.bf16.mxu0 %v1474_v53  ;;  %895 = vmatprep.mubr.msk.bf16.mxu0 %vm1475_vm2, %v1474_v53  ;;  %vm592_vm3 = vcmask 261120   ;;  %v856_v56 = vld [vmem:[%s1927_s30] ss:$0 sm:$0xff]  ;;  %s2139_s11 = sld [smem:[#allocation27_spill]]  ;;  %s663_s0 = sshll.u32 %s432_s15, 4  ;;  %s1951_s0 = int_to_ptr.vmem [resolvable:$true] %s663_s0 }
 0x35f   : > { %892 = vmatpush3.bf16.msra.mxu0 %v1097_v52  ;;  %s2140_s17 = sld [smem:[#allocation39_spill]]  ;;  %s1957_s25 = scalar_lea.sflag [#allocation5], %s430_s2 }
 0x360   : > { %893 = vmatprep.subr.bf16.mxu0 %v1474_v53  ;;  %s1301_s6 = scalar_lea.vmem %s1951_s0, 128  ;;  %s1476_s3 = smov [#allocation15]  }
 0x361   : > { %p1302_p13 = scmp.ne.s32.totalorder %s1951_s0, %s1301_s6  ;;  %s1305_s30 = sshll.u32 %s1476_s3, 4  ;;  %s1306_s30 = int_to_ptr.vmem [resolvable:$false] %s1305_s30 }
 0x362   : > { %s1307_s18 = scalar_lea.vmem %s1306_s30, 256  ;;  %p1308_p7 = scmp.lt.s32.totalorder %s1951_s0, %s1306_s30 }
 0x363   : > { %894 = vmatpush3.bf16.msra.mxu0 %v1098_v54  ;;  %v568_v55 = vld [vmem:[#allocation2] sm:$0xff]  ;;  %s871_s23 = sshll.u32 %s2136_s21, 2  ;;  %p1309_p12 = scmp.lt.s32.totalorder %s1307_s18, %s1301_s6 }
 0x364   : > { %s660_s24 = sadd.s32 %s2137_s19, %s871_s23  ;;  %p2141_p2 = scmp.ne.s32.totalorder %s2139_s11, 0 }
 0x365   : > { %s865_s7 = sshll.u32 %s660_s24, 6  ;;  %p1310_p3 = por %p1309_p12, %p1308_p7 }
 0x366   : > { %896 = vmatmul.mubr.msk.bf16.vlgmr.msra.gmra.mrb[0].mxu0 %vm592_vm3, %v568_v55  ;;  %s1949_s27 = scalar_lea.hbm %s2140_s17, %s865_s7  ;;  %p1303_p10 = pnand %p1302_p13, %p2141_p2 }
 0x368   : > { %p1304_p11 = pneg %p1303_p10 }
 0x36a   : > { %p1311_p9 = pnand %p1310_p3, %p1304_p11 }
 0x439   : > { %v630_v57 = vpop.f32.mrb[0].mxu0 }
 0x43a   : > { %v897_v58 = vpop.f32.mrb[1].mxu0  ;;  %v631_v60 = vadd.f32 %v856_v56, %v630_v57 }
 0x43b   : > { %v633_v59 = vpop.f32.mrb[2].mxu0 }
 0x43c   : > { %v634_v61 = vadd.f32 %v856_v56, %v633_v59  ;;  %v898_v62 = vpop.f32.mrb[3].mxu0 }
 0x43e   : > { %v875_v63 = vpack.c.bf16 %v634_v61, %v631_v60 }
 0x440   : > { %876 = vst [vmem:[%s432_s15] sm:$0xff] %v875_v63  }
 0x441   : > { %1314 = shalt.err (!%p1311_p9)
}
 0x442   : > { %s1315_s2 = scalar_lea.hbm %s1949_s27, 128  ;;  %s1319_s21 = scalar_lea.hbm %s2140_s17, 512 }
 0x443   : > { %p1316_p8 = scmp.ne.s32.totalorder %s1949_s27, %s1315_s2  ;;  %p1320_p1 = scmp.lt.u32.totalorder %s1949_s27, %s2140_s17 }
 0x444   : > { %p1321_p5 = scmp.lt.u32.totalorder %s1319_s21, %s1315_s2  ;;  %p1323_p13 = scmp.lt.u32.totalorder %s1315_s2, %s1949_s27 }
 0x445   : > { %p1317_p0 = pnand %p1316_p8, %p2141_p2 }
 0x446   : > { %p1322_p4 = por %p1321_p5, %p1320_p1 }
 0x447   : > { %p1318_p6 = pneg %p1317_p0 }
 0x448   : > { %p1324_p10 = por %p1323_p13, %p1322_p4 }
 0x44a   : > { %p1325_p11 = pnand %p1324_p10, %p1318_p6 }
 0x44c   : > { %1328 = shalt.err (!%p1325_p11)
}
 0x44d   : > { %s1477_s23 = smov 64   ;;  %s1478_s24 = smov 128  }
 0x44e   : > { %s1479_s7 = smov 4  }
 0x44f   : > { %921 = dma.vmem_to_hbm [thread:$0]  (%p2141_p2), %s1951_s0, 128, %s1949_s27, %s1957_s25, %s1477_s23, %s1478_s24, %s1479_s7  }
 0x450 PF: > { %s2142_s20 = sld [smem:[#allocation21_spill]]  ;;  %s2143_s22 = sld [smem:[#allocation28_spill]] }
 0x451   : > { %p959_p7 = scmp.ge.s32.totalorder %s1459_s14, 2 }
 0x456   : > { %s678_s6 = sand.u32 1, %s2142_s20   ;;  %p2144_p12 = scmp.ne.s32.totalorder %s2143_s22, 0 }
 0x457   : > { %s679_s3 = scalar_lea.sflag [#allocation5], %s678_s6 }
 0x458   : > { %p947_p3 = pnand %p959_p7, %p2144_p12 }
 0x45a   : > { %1402 = dma.done.wait (!%p947_p3), %s679_s3, 128  }
 0x45b   : > { %1404 = vsyncadd (!%p947_p3), %s679_s3, 4294967168  ;;  %s28_s14 = sadd.s32 1, %s1459_s14   ;;  %s2146_s24 = sld [smem:[#allocation22_spill]] }
 0x45c   : > { %p1986_p9 = scmp.ge.s32.totalorder %s28_s14, 6   ;;  %s2147_s27 = sld [smem:[#allocation23_spill]] }
 0x45d   : > { %s2148_s11 = smov %s1820_s28  ;;  %s2149_s0 = sld [smem:[#allocation30_spill]] }
 0x45e   : > { %s2150_s18 = sld [smem:[#allocation31_spill]]  ;;  %s2152_s25 = smov %s1415_s26 }
 0x45f   : > { %s2153_s26 = smov %s1827_s16  ;;  %s2154_s28 = smov %s1427_s29 }
 0x460   : > { %s2155_s29 = smov %s2148_s11  ;;  %s2156_s30 = smov %s1435_s8 }
 0x461   : > { %s2157_s8 = smov %s1439_s9  ;;  %s2158_s9 = smov %s1823_s1 }
 0x462   : > { %s2159_s10 = smov %s1451_s12  ;;  %s2160_s11 = smov %s1455_s13 }
 0x463   : > { %s2161_s12 = smov %s2149_s0  ;;  %27 = sbr.rel (!%p1986_p9) target bundleno = 23 (0x17), region = 137 }
 0x464   : > { %s2162_s13 = smov %s2150_s18 }
 0x46a   :  { %684 = vsyncpa [#allocation4], 1 }
 0x46b   :  { %686 = vsyncpa [#allocation4 + $0x1], 1 }
 0x46c   :  { %687 = vsyncpa [#allocation7], 1 }
 0x46d   :  { %688 = vsyncpa [#allocation10], 1 }
 0x46e   :  { %689 = vsyncpa [#allocation13], 1 }
 0x46f   :  { %691 = vsyncpa [#allocation13 + $0x1], 1 }
 0x470   :  { %692 = vsyncpa [#allocation5], 1 }
 0x471   :  { %694 = vsyncpa [#allocation5 + $0x1], 1 }

// kernel: bert_pretraining_heads.3
= control target key start
LH: loop header
LB: loop body
LE: loop exit
PB: predicated region body
PF: predicated region fallthrough
CT: control target
= control target key end

     0   :  { %s2427_s0 = inlined_call_operand.hbm [shape: f32[16,96], index: 0, kind: input, shape index: {}]   ;;  %s2428_s1 = inlined_call_operand.hbm [shape: bf16[96,32], index: 1, kind: input, shape index: {}]   ;;  %s2429_s2 = inlined_call_operand.hbm [shape: f32[1,32], index: 2, kind: input, shape index: {}]   ;;  %s2430_s3 = inlined_call_operand.hbm [shape: f32[1,32], index: 3, kind: input, shape index: {}]   ;;  %s2431_s4 = inlined_call_operand.hbm [shape: f32[1,32], index: 4, kind: input, shape index: {}]   ;;  %s2432_s5 = inlined_call_operand.hbm [shape: bf16[32,32], index: 5, kind: input, shape index: {}]   ;;  %s2433_s6 = inlined_call_operand.hbm [shape: f32[1,32], index: 6, kind: input, shape index: {}]   ;;  %s2434_s7 = inlined_call_operand.hbm [shape: f32[1,32], index: 7, kind: input, shape index: {}]   ;;  %s2435_s8 = inlined_call_operand.hbm [shape: f32[1,32], index: 8, kind: input, shape index: {}]   ;;  %s2436_s9 = inlined_call_operand.hbm [shape: bf16[32,256], index: 9, kind: input, shape index: {}]   ;;  %s2437_s10 = inlined_call_operand.hbm [shape: f32[1,256], index: 10, kind: input, shape index: {}]   ;;  %s2438_s11 = inlined_call_operand.hbm [shape: bf16[16,256], index: 11, kind: output, shape index: {}]  }
   0x1   :  { %2459 = sst [smem:[#allocation35_spill]] %s2428_s1 }
   0x2   :  { %2460 = sst [smem:[#allocation36_spill]] %s2430_s3 }
   0x3   :  { %2461 = sst [smem:[#allocation37_spill]] %s2432_s5 }
   0x4   :  { %2462 = sst [smem:[#allocation38_spill]] %s2434_s7 }
   0x5   :  { %2463 = sst [smem:[#allocation39_spill]] %s2435_s8 }
   0x6   :  { %2464 = sst [smem:[#allocation40_spill]] %s2436_s9 }
   0x7   :  { %2465 = sst [smem:[#allocation41_spill]] %s2437_s10 }
   0x8   :  { %2466 = sst [smem:[#allocation42_spill]] %s2438_s11 }
   0x9   :  { %16 = vsyncpa [#allocation4], 0 }
   0xa   :  { %17 = vsyncpa [#allocation7], 0 }
   0xb   :  { %18 = vsyncpa [#allocation10], 0 }
   0xc   :  { %19 = vsyncpa [#allocation13], 0 }
   0xd   :  { %20 = vsyncpa [#allocation16], 0 }
   0xe   :  { %21 = vsyncpa [#allocation19], 0 }
   0xf   :  { %23 = vsyncpa [#allocation19 + $0x1], 0 }
  0x10   :  { %24 = vsyncpa [#allocation5], 0 }
  0x11   :  { %26 = vsyncpa [#allocation5 + $0x1], 0  ;;  %s1952_s17 = smov 0   ;;  %s1954_s18 = smov 0  }
  0x12   :  { %s1956_s19 = smov 0   ;;  %s1958_s20 = smov 0  }
  0x13   :  { %s1960_s21 = smov 0   ;;  %s1962_s22 = smov 0  }
  0x14 LB: > { %2467 = sst [smem:[#allocation29_spill]] %s1859_s20  ;;  %s1869_s23 = smov [#allocation6]   ;;  %s1867_s22 = sphi %s1962_s22, %s32_s22   ;;  %s1863_s21 = sphi %s1960_s21, %s2523_s21   ;;  %s1859_s20 = sphi %s1958_s20, %s2522_s20   ;;  %s1855_s19 = sphi %s1956_s19, %s2521_s19   ;;  %s1851_s18 = sphi %s1954_s18, %s2520_s18   ;;  %s1847_s17 = sphi %s1952_s17, %s2519_s17  }
  0x15   : > { %2468 = sst [smem:[#allocation30_spill]] %s1867_s22  ;;  %s351_s24 = sshll.u32 %s1869_s23, 4  ;;  %s1988_s24 = int_to_ptr.vmem [resolvable:$true] %s351_s24 }
  0x16   : > { %s1983_s25 = sadd.s32 4294967295, %s1867_s22   ;;  %p1153_p0 = scmp.ge.s32.totalorder %s1867_s22, 1 }
  0x17   : > { %p2443_p1 = scmp.eq.s32.totalorder %s1983_s25, 0  ;;  %p323_p2 = scmp.lt.s32.totalorder %s1867_s22, 3 }
  0x18   : > { %s1870_s27 = smov [#allocation9]   ;;  %s1871_s30 = smov [#allocation12]  }
  0x19   : > { %p1990_p3 = pnand %p1153_p0, %p323_p2  ;;  %s376_s28 = sshll.u32 %s1870_s27, 4  ;;  %s2003_s28 = int_to_ptr.vmem [resolvable:$true] %s376_s28 }
  0x1a   : > { %s397_s12 = sshll.u32 %s1871_s30, 4  ;;  %s2472_s1 = sld [smem:[#allocation35_spill]]  ;;  %s2005_s12 = int_to_ptr.vmem [resolvable:$true] %s397_s12 }
  0x1b   : > { %s2469_s26 = scalar_select %p1990_p3, 1, 0 }
  0x1c   : > { %p1300_p5 = pneg %p1990_p3 }
  0x1d   : > { %2470 = sst [smem:[#allocation31_spill]] %s2469_s26 }
  0x1e   : > { %p1999_p6 = pnand %p1300_p5, %p2443_p1 }
  0x20   : > { %s2471_s29 = scalar_select %p1999_p6, 1, 0 }
  0x21   : > { %s1453_s15 = scalar_lea.hbm %s2472_s1, 768  ;;  %p2015_p8 = pneg %p1999_p6 }
  0x22   : > { %p1454_p7 = scmp.ne.s32.totalorder %s2472_s1, %s1453_s15  ;;  %p1460_p11 = scmp.lt.u32.totalorder %s1453_s15, %s2472_s1 }
  0x24   : > { %p1456_p9 = pnand %p2015_p8, %p1454_p7 }
  0x26   : > { %p1457_p10 = pneg %p1456_p9 }
  0x28   : > { %p1462_p12 = pnand %p1460_p11, %p1457_p10 }
  0x2a   : > { %1465 = shalt.err (!%p1462_p12)
}
  0x2b   : > { %s1466_s13 = scalar_lea.vmem %s1988_s24, 768  ;;  %p1474_p5 = scmp.lt.s32.totalorder %s1988_s24, %s1988_s24 }
  0x2c   : > { %p1467_p13 = scmp.ne.s32.totalorder %s1988_s24, %s1466_s13  ;;  %p1475_p4 = scmp.lt.s32.totalorder %s1466_s13, %s1466_s13 }
  0x2e   : > { %p1469_p0 = pnand %p1467_p13, %p2015_p8  ;;  %p1476_p7 = por %p1475_p4, %p1474_p5 }
  0x30   : > { %p1470_p2 = pneg %p1469_p0 }
  0x32   : > { %p1477_p9 = pnand %p1476_p7, %p1470_p2 }
  0x34   : > { %1480 = shalt.err (!%p1477_p9)
}
  0x35   : > { %s2445_s14 = smov 64   ;;  %s2446_s11 = smov 4  }
  0x36   : > { %1306 = dma.hbm_to_vmem [thread:$0]  (!%p1999_p6), %s2472_s1, 768, %s1988_s24, [#allocation7], %s2445_s14, %s2445_s14, %s2446_s11  }
  0x37   : > { %s2474_s3 = sld [smem:[#allocation36_spill]] }
  0x3d   : > { %s1481_s13 = scalar_lea.hbm %s2474_s3, 16 }
  0x3e   : > { %p1482_p4 = scmp.ne.s32.totalorder %s2474_s3, %s1481_s13  ;;  %p1488_p12 = scmp.lt.u32.totalorder %s1481_s13, %s2474_s3 }
  0x40   : > { %p1484_p10 = pnand %p1482_p4, %p2015_p8 }
  0x42   : > { %p1485_p11 = pneg %p1484_p10 }
  0x44   : > { %p1490_p13 = pnand %p1488_p12, %p1485_p11 }
  0x46   : > { %1493 = shalt.err (!%p1490_p13)
}
  0x47   : > { %s1494_s24 = scalar_lea.vmem %s2003_s28, 16  ;;  %s1501_s20 = scalar_lea.vmem %s2003_s28, 32 }
  0x48   : > { %p1495_p0 = scmp.ne.s32.totalorder %s2003_s28, %s1494_s24  ;;  %p1502_p7 = scmp.lt.s32.totalorder %s2003_s28, %s2003_s28 }
  0x49   : > { %p1503_p9 = scmp.lt.s32.totalorder %s1501_s20, %s1494_s24 }
  0x4a   : > { %p1497_p2 = pnand %p1495_p0, %p2015_p8 }
  0x4b   : > { %p1504_p4 = por %p1503_p9, %p1502_p7 }
  0x4c   : > { %p1498_p5 = pneg %p1497_p2 }
  0x4e   : > { %p1505_p10 = pnand %p1504_p4, %p1498_p5 }
  0x50   : > { %1508 = shalt.err (!%p1505_p10)
}
  0x51   : > { %1312 = dma.hbm_to_vmem [thread:$0]  (!%p1999_p6), %s2474_s3, 16, %s2003_s28, [#allocation10]  }
  0x52   : > { %s2475_s5 = sld [smem:[#allocation37_spill]] }
  0x58   : > { %s1509_s16 = scalar_lea.hbm %s2475_s5, 256 }
  0x59   : > { %p1510_p11 = scmp.ne.s32.totalorder %s2475_s5, %s1509_s16  ;;  %p1516_p0 = scmp.lt.u32.totalorder %s1509_s16, %s2475_s5 }
  0x5b   : > { %p1512_p12 = pnand %p1510_p11, %p2015_p8 }
  0x5d   : > { %p1513_p13 = pneg %p1512_p12 }
  0x5f   : > { %p1518_p2 = pnand %p1516_p0, %p1513_p13 }
  0x61   : > { %1521 = shalt.err (!%p1518_p2)
}
  0x62   : > { %s1522_s28 = scalar_lea.vmem %s2005_s12, 256  ;;  %p1530_p4 = scmp.lt.s32.totalorder %s2005_s12, %s2005_s12 }
  0x63   : > { %p1523_p5 = scmp.ne.s32.totalorder %s2005_s12, %s1522_s28  ;;  %p1531_p10 = scmp.lt.s32.totalorder %s1522_s28, %s1522_s28 }
  0x65   : > { %p1525_p7 = pnand %p1523_p5, %p2015_p8  ;;  %p1532_p11 = por %p1531_p10, %p1530_p4 }
  0x67   : > { %p1526_p9 = pneg %p1525_p7 }
  0x69   : > { %p1533_p12 = pnand %p1532_p11, %p1526_p9 }
  0x6b   : > { %1536 = shalt.err (!%p1533_p12)
}
  0x6c   : > { %1318 = dma.hbm_to_vmem [thread:$0]  (!%p1999_p6), %s2475_s5, 256, %s2005_s12, [#allocation13], %s2445_s14, %s2445_s14, %s2446_s11  }
  0x6d   : > { %s1874_s10 = smov [#allocation15]   ;;  %s2476_s7 = sld [smem:[#allocation38_spill]] }
  0x6e   : > { %s422_s26 = sshll.u32 %s1874_s10, 4  ;;  %s423_s26 = int_to_ptr.vmem [resolvable:$true] %s422_s26 }
  0x73   : > { %s1537_s23 = scalar_lea.hbm %s2476_s7, 16 }
  0x74   : > { %p1538_p13 = scmp.ne.s32.totalorder %s2476_s7, %s1537_s23  ;;  %p1544_p5 = scmp.lt.u32.totalorder %s1537_s23, %s2476_s7 }
  0x76   : > { %p1540_p0 = pnand %p1538_p13, %p2015_p8 }
  0x78   : > { %p1541_p2 = pneg %p1540_p0 }
  0x7a   : > { %p1546_p7 = pnand %p1544_p5, %p1541_p2 }
  0x7c   : > { %1549 = shalt.err (!%p1546_p7)
}
  0x7d   : > { %s1550_s12 = scalar_lea.vmem %s423_s26, 16  ;;  %s1557_s20 = scalar_lea.vmem %s423_s26, 32 }
  0x7e   : > { %p1551_p9 = scmp.ne.s32.totalorder %s423_s26, %s1550_s12  ;;  %p1558_p11 = scmp.lt.s32.totalorder %s423_s26, %s423_s26 }
  0x7f   : > { %p1559_p12 = scmp.lt.s32.totalorder %s1557_s20, %s1550_s12 }
  0x80   : > { %p1553_p4 = pnand %p1551_p9, %p2015_p8 }
  0x81   : > { %p1560_p1 = por %p1559_p12, %p1558_p11 }
  0x82   : > { %p1554_p10 = pneg %p1553_p4 }
  0x84   : > { %p1561_p3 = pnand %p1560_p1, %p1554_p10 }
  0x86   : > { %1564 = shalt.err (!%p1561_p3)
}
  0x87   : > { %1324 = dma.hbm_to_vmem [thread:$0]  (!%p1999_p6), %s2476_s7, 16, %s423_s26, [#allocation16]  }
  0x88   : > { %s1152_s15 = sadd.s32 4294967294, %s1867_s22   ;;  %s41_s16 = sadd.s32 1, %s1863_s21 }
  0x89   : > { %p42_p1 = scmp.ge.s32.totalorder %s41_s16, 2  ;;  %s245_s23 = sadd.s32 1, %s1855_s19 }
  0x8a   : > { %p252_p3 = scmp.ne.s32.totalorder %s1855_s19, %s1851_s18  ;;  %p253_p13 = scmp.eq.s32.totalorder %s1867_s22, 0 }
  0x8b   : > { %s2525_s16 = smov (%p42_p1, %s41_s16), 0  ;;  %p258_p2 = scmp.ne.s32.totalorder %s1851_s18, %s1847_s17 }
  0x8c   : > { %2477 = sst [smem:[#allocation32_spill]] %s2525_s16  ;;  %p2115_p0 = por %p253_p13, %p252_p3 }
  0x8d   : > { %s242_s26 = ssub.s32 %s1863_s21, %s2525_s16  ;;  %p310_p5 = scmp.eq.s32.totalorder %s1983_s25, 1 }
  0x8e   : > { %p243_p7 = scmp.eq.s32.totalorder %s242_s26, 0  ;;  %p2479_p9 = scmp.eq.s32.totalorder %s1983_s25, 0 }
  0x8f   : > { %p2130_p10 = por %p310_p5, %p252_p3  ;;  %p316_p11 = scmp.eq.s32.totalorder %s1152_s15, 1 }
  0x90   : > { %p2126_p4 = por %p2479_p9, %p258_p2  ;;  %p1348_p1 = scmp.lt.s32.totalorder %s1867_s22, 2 }
  0x91   : > { %s2481_s24 = scalar_select %p2130_p10, 1, 0 }
  0x92   : > { %s2480_s13 = scalar_select %p2126_p4, 1, 0 }
  0x93   : > { %s2135_s28 = scalar_select %p243_p7, %s1855_s19, %s245_s23  }
  0x94   : > { %p2137_p12 = por %p316_p11, %p258_p2  ;;  %s444_s20 = sand.u32 1, %s1867_s22  }
  0x95   : > { %2482 = sst [smem:[#allocation33_spill]] %s2135_s28  ;;  %s2447_s8 = sand.u32 1, %s1855_s19  }
  0x96   : > { %s2483_s12 = scalar_select %p2137_p12, 1, 0 }
  0x97   : > { %s1164_s10 = sshll.u32 %s2447_s8, 4  ;;  %s1165_s26 = sshll.u32 %s1863_s21, 6 }
  0x98   : > { %2484 = sst [smem:[#allocation34_spill]] %s2483_s12  ;;  %s448_s15 = scalar_lea.vmem [#allocation18], %s1164_s10 }
  0x99   : > { %s2485_s9 = sld [smem:[#allocation40_spill]]  ;;  %s454_s23 = sshll.u32 %s448_s15, 4  ;;  %s2158_s23 = int_to_ptr.vmem [resolvable:$true] %s454_s23 }
  0x9a   : > { %p2154_p3 = pnand %p1348_p1, %p2115_p0  ;;  %s2160_s8 = scalar_lea.sflag [#allocation19], %s444_s20 }
  0x9c   : > { %s2486_s3 = scalar_select %p2154_p3, 1, 0 }
  0x9d   : > { %p2456_p2 = pneg %p2154_p3 }
  0x9f   : > { %s2150_s1 = scalar_lea.hbm %s2485_s9, %s1165_s26  ;;  %s1570_s10 = scalar_lea.hbm %s2485_s9, 512 }
  0xa0   : > { %s1565_s14 = scalar_lea.hbm %s2150_s1, 256  ;;  %p1571_p0 = scmp.lt.u32.totalorder %s2150_s1, %s2485_s9 }
  0xa1   : > { %p1566_p13 = scmp.ne.s32.totalorder %s2150_s1, %s1565_s14  ;;  %p1572_p9 = scmp.lt.u32.totalorder %s1570_s10, %s1565_s14 }
  0xa2   : > { %p1574_p1 = scmp.lt.u32.totalorder %s1565_s14, %s2150_s1 }
  0xa3   : > { %p1568_p5 = pnand %p2456_p2, %p1566_p13  ;;  %p1573_p11 = por %p1572_p9, %p1571_p0 }
  0xa5   : > { %p1569_p7 = pneg %p1568_p5  ;;  %p1575_p12 = por %p1574_p1, %p1573_p11 }
  0xa7   : > { %p1576_p10 = pnand %p1575_p12, %p1569_p7 }
  0xa9   : > { %1579 = shalt.err (!%p1576_p10)
}
  0xaa   : > { %s1580_s20 = scalar_lea.vmem %s2158_s23, 256  ;;  %s1875_s11 = smov [#allocation18]  }
  0xab   : > { %p1581_p13 = scmp.ne.s32.totalorder %s2158_s23, %s1580_s20  ;;  %s1585_s30 = sshll.u32 %s1875_s11, 4  ;;  %s1586_s30 = int_to_ptr.vmem [resolvable:$false] %s1585_s30 }
  0xac   : > { %s1587_s26 = scalar_lea.vmem %s1586_s30, 512  ;;  %p1588_p6 = scmp.lt.s32.totalorder %s2158_s23, %s1586_s30 }
  0xad   : > { %p1583_p5 = pnand %p1581_p13, %p2456_p2  ;;  %p1589_p0 = scmp.lt.s32.totalorder %s1587_s26, %s1580_s20 }
  0xaf   : > { %p1584_p4 = pneg %p1583_p5  ;;  %p1590_p9 = por %p1589_p0, %p1588_p6 }
  0xb1   : > { %p1591_p11 = pnand %p1590_p9, %p1584_p4 }
  0xb3   : > { %1594 = shalt.err (!%p1591_p11)
}
  0xb4   : > { %s1876_s14 = smov 128   ;;  %s2487_s10 = smov 4  }
  0xb5   : > { %s2488_s15 = smov 64   ;;  %s1877_s5 = smov [#allocation3]  }
  0xb6   : > { %1331 = dma.hbm_to_vmem [thread:$0]  (!%p2154_p3), %s2150_s1, 256, %s2158_s23, %s2160_s8, %s1876_s14, %s2488_s15, %s2487_s10  }
  0xb7   : > { %s338_s7 = sshll.u32 %s1877_s5, 4  ;;  %s1878_s11 = smov [#allocation8]   ;;  %s339_s7 = int_to_ptr.vmem [resolvable:$true] %s338_s7 }
  0xb8   : > { %s365_s9 = sshll.u32 %s1878_s11, 4  ;;  %s1595_s26 = scalar_lea.hbm %s2427_s0, 256  ;;  %s366_s9 = int_to_ptr.vmem [resolvable:$true] %s365_s9 }
  0xb9   : > { %p1596_p6 = scmp.ne.s32.totalorder %s2427_s0, %s1595_s26  ;;  %p1602_p12 = scmp.lt.u32.totalorder %s1595_s26, %s2427_s0 }
  0xbb   : > { %p1598_p4 = pnand %p1596_p6, %p2015_p8 }
  0xbd   : > { %p1599_p10 = pneg %p1598_p4 }
  0xbf   : > { %p1604_p7 = pnand %p1602_p12, %p1599_p10 }
  0xc1   : > { %1607 = shalt.err (!%p1604_p7)
}
  0xc2   : > { %s1608_s1 = scalar_lea.vmem %s339_s7, 256  ;;  %p1616_p0 = scmp.lt.s32.totalorder %s339_s7, %s339_s7 }
  0xc3   : > { %p1609_p1 = scmp.ne.s32.totalorder %s339_s7, %s1608_s1  ;;  %p1617_p9 = scmp.lt.s32.totalorder %s1608_s1, %s1608_s1 }
  0xc5   : > { %p1611_p13 = pnand %p1609_p1, %p2015_p8  ;;  %p1618_p11 = por %p1617_p9, %p1616_p0 }
  0xc7   : > { %p1612_p5 = pneg %p1611_p13 }
  0xc9   : > { %p1619_p2 = pnand %p1618_p11, %p1612_p5 }
  0xcb   : > { %1622 = shalt.err (!%p1619_p2)
}
  0xcc   : > { %s1879_s5 = smov 8   ;;  %p2489_p6 = scmp.ne.s32.totalorder %s2471_s29, 0 }
  0xcd   : > { %s1623_s23 = scalar_lea.hbm %s2429_s2, 16 }
  0xce   : > { %1303 = dma.hbm_to_vmem [thread:$0]  (!%p2489_p6), %s2427_s0, 256, %s339_s7, [#allocation4], %s1876_s14, %s1876_s14, %s1879_s5  }
  0xcf   : > { %p1624_p4 = scmp.ne.s32.totalorder %s2429_s2, %s1623_s23  ;;  %p1630_p12 = scmp.lt.u32.totalorder %s1623_s23, %s2429_s2 }
  0xd1   : > { %p1626_p10 = pnand %p1624_p4, %p2015_p8 }
  0xd3   : > { %p1627_p2 = pneg %p1626_p10 }
  0xd5   : > { %p1632_p7 = pnand %p1630_p12, %p1627_p2 }
  0xd7   : > { %1635 = shalt.err (!%p1632_p7)
}
  0xd8   : > { %s1636_s20 = scalar_lea.vmem %s366_s9, 16  ;;  %s1643_s7 = scalar_lea.vmem %s366_s9, 32 }
  0xd9   : > { %p1637_p1 = scmp.ne.s32.totalorder %s366_s9, %s1636_s20  ;;  %p1644_p0 = scmp.lt.s32.totalorder %s366_s9, %s366_s9 }
  0xda   : > { %p1645_p9 = scmp.lt.s32.totalorder %s1643_s7, %s1636_s20 }
  0xdb   : > { %p1639_p13 = pnand %p1637_p1, %p2015_p8 }
  0xdc   : > { %p1646_p11 = por %p1645_p9, %p1644_p0 }
  0xdd   : > { %p1640_p5 = pneg %p1639_p13 }
  0xdf   : > { %p1647_p3 = pnand %p1646_p11, %p1640_p5 }
  0xe1   : > { %1650 = shalt.err (!%p1647_p3)
}
  0xe2   : > { %1309 = dma.hbm_to_vmem [thread:$0]  (!%p2489_p6), %s2429_s2, 16, %s366_s9, [#allocation7]  }
  0xe3   : > { %s1880_s1 = smov [#allocation11]   ;;  %s1881_s16 = smov [#allocation14]  }
  0xe4   : > { %s387_s5 = sshll.u32 %s1880_s1, 4  ;;  %s411_s28 = sshll.u32 %s1881_s16, 4  ;;  %s388_s5 = int_to_ptr.vmem [resolvable:$true] %s387_s5  ;;  %s412_s28 = int_to_ptr.vmem [resolvable:$true] %s411_s28 }
  0xe5   : > { %s1651_s23 = scalar_lea.hbm %s2431_s4, 16 }
  0xe6   : > { %p1652_p3 = scmp.ne.s32.totalorder %s2431_s4, %s1651_s23  ;;  %p1658_p2 = scmp.lt.u32.totalorder %s1651_s23, %s2431_s4 }
  0xe8   : > { %p1654_p4 = pnand %p1652_p3, %p2015_p8 }
  0xea   : > { %p1655_p10 = pneg %p1654_p4 }
  0xec   : > { %p1660_p12 = pnand %p1658_p2, %p1655_p10 }
  0xee   : > { %1663 = shalt.err (!%p1660_p12)
}
  0xef   : > { %s1664_s9 = scalar_lea.vmem %s388_s5, 16  ;;  %s1671_s20 = scalar_lea.vmem %s388_s5, 32 }
  0xf0   : > { %p1665_p7 = scmp.ne.s32.totalorder %s388_s5, %s1664_s9  ;;  %p1672_p5 = scmp.lt.s32.totalorder %s388_s5, %s388_s5 }
  0xf1   : > { %p1673_p0 = scmp.lt.s32.totalorder %s1671_s20, %s1664_s9 }
  0xf2   : > { %p1667_p1 = pnand %p1665_p7, %p2015_p8 }
  0xf3   : > { %p1674_p9 = por %p1673_p0, %p1672_p5 }
  0xf4   : > { %p1668_p13 = pneg %p1667_p1 }
  0xf6   : > { %p1675_p11 = pnand %p1674_p9, %p1668_p13 }
  0xf8   : > { %1678 = shalt.err (!%p1675_p11)
}
  0xf9   : > { %1315 = dma.hbm_to_vmem [thread:$0]  (!%p2489_p6), %s2431_s4, 16, %s388_s5, [#allocation10]  }
  0xfa   : > { %s1679_s16 = scalar_lea.hbm %s2433_s6, 16 }
  0xfb   : > { %p1680_p3 = scmp.ne.s32.totalorder %s2433_s6, %s1679_s16  ;;  %p1686_p2 = scmp.lt.u32.totalorder %s1679_s16, %s2433_s6 }
  0xfd   : > { %p1682_p4 = pnand %p1680_p3, %p2015_p8 }
  0xff   : > { %p1683_p10 = pneg %p1682_p4 }
 0x101   : > { %p1688_p12 = pnand %p1686_p2, %p1683_p10 }
 0x103   : > { %1691 = shalt.err (!%p1688_p12)
}
 0x104   : > { %s1692_s15 = scalar_lea.vmem %s412_s28, 16  ;;  %s1699_s5 = scalar_lea.vmem %s412_s28, 32 }
 0x105   : > { %p1693_p7 = scmp.ne.s32.totalorder %s412_s28, %s1692_s15  ;;  %p1700_p5 = scmp.lt.s32.totalorder %s412_s28, %s412_s28 }
 0x106   : > { %p1701_p0 = scmp.lt.s32.totalorder %s1699_s5, %s1692_s15 }
 0x107   : > { %p1695_p1 = pnand %p1693_p7, %p2015_p8 }
 0x108   : > { %p1702_p9 = por %p1701_p0, %p1700_p5 }
 0x109   : > { %p1696_p13 = pneg %p1695_p1 }
 0x10b   : > { %p1703_p11 = pnand %p1702_p9, %p1696_p13 }
 0x10d   : > { %1706 = shalt.err (!%p1703_p11)
}
 0x10e   : > { %1321 = dma.hbm_to_vmem [thread:$0]  (!%p2489_p6), %s2433_s6, 16, %s412_s28, [#allocation13]  }
 0x10f   : > { %s1882_s9 = smov [#allocation17]   ;;  %s1166_s7 = sshll.u32 %s1863_s21, 4 }
 0x110   : > { %s433_s20 = sshll.u32 %s1882_s9, 4  ;;  %s2490_s1 = sld [smem:[#allocation39_spill]]  ;;  %s434_s20 = int_to_ptr.vmem [resolvable:$true] %s433_s20 }
 0x116   : > { %s1707_s16 = scalar_lea.hbm %s2490_s1, 16 }
 0x117   : > { %p1708_p3 = scmp.ne.s32.totalorder %s2490_s1, %s1707_s16  ;;  %p1714_p2 = scmp.lt.u32.totalorder %s1707_s16, %s2490_s1 }
 0x119   : > { %p1710_p4 = pnand %p1708_p3, %p2015_p8 }
 0x11b   : > { %p1711_p10 = pneg %p1710_p4 }
 0x11d   : > { %p1716_p12 = pnand %p1714_p2, %p1711_p10 }
 0x11f   : > { %1719 = shalt.err (!%p1716_p12)
}
 0x120   : > { %s1720_s28 = scalar_lea.vmem %s434_s20, 16  ;;  %s1727_s15 = scalar_lea.vmem %s434_s20, 32 }
 0x121   : > { %p1721_p7 = scmp.ne.s32.totalorder %s434_s20, %s1720_s28  ;;  %p1728_p5 = scmp.lt.s32.totalorder %s434_s20, %s434_s20 }
 0x122   : > { %p1729_p0 = scmp.lt.s32.totalorder %s1727_s15, %s1720_s28 }
 0x123   : > { %p1723_p1 = pnand %p1721_p7, %p2015_p8 }
 0x124   : > { %p1730_p9 = por %p1729_p0, %p1728_p5 }
 0x125   : > { %p1724_p13 = pneg %p1723_p1 }
 0x127   : > { %p1731_p11 = pnand %p1730_p9, %p1724_p13 }
 0x129   : > { %1734 = shalt.err (!%p1731_p11)
}
 0x12a   : > { %1327 = dma.hbm_to_vmem [thread:$0]  (!%p2489_p6), %s2490_s1, 16, %s434_s20, [#allocation16]  }
 0x12b   : > { %s2491_s14 = sld [smem:[#allocation41_spill]]  ;;  %s2492_s26 = sand.u32 1, %s1855_s19  }
 0x12c   : > { %s467_s16 = scalar_lea.vmem [#allocation20], %s2492_s26  ;;  %p2493_p3 = scmp.ne.s32.totalorder %s2486_s3, 0 }
 0x12d   : > { %s474_s22 = sshll.u32 %s467_s16, 4  ;;  %s475_s22 = int_to_ptr.vmem [resolvable:$true] %s474_s22 }
 0x12e   : > { %p2494_p4 = pneg %p2493_p3 }
 0x131   : > { %s2284_s27 = scalar_lea.hbm %s2491_s14, %s1166_s7  ;;  %s1740_s23 = scalar_lea.hbm %s2491_s14, 32 }
 0x132   : > { %s1735_s29 = scalar_lea.hbm %s2284_s27, 16  ;;  %p1741_p6 = scmp.lt.u32.totalorder %s2284_s27, %s2491_s14 }
 0x133   : > { %p1736_p8 = scmp.ne.s32.totalorder %s2284_s27, %s1735_s29  ;;  %p1742_p12 = scmp.lt.u32.totalorder %s1740_s23, %s1735_s29 }
 0x134   : > { %p1744_p1 = scmp.lt.u32.totalorder %s1735_s29, %s2284_s27 }
 0x135   : > { %p1738_p10 = pnand %p1736_p8, %p2494_p4  ;;  %p1743_p7 = por %p1742_p12, %p1741_p6 }
 0x137   : > { %p1739_p2 = pneg %p1738_p10  ;;  %p1745_p13 = por %p1744_p1, %p1743_p7 }
 0x139   : > { %p1746_p5 = pnand %p1745_p13, %p1739_p2 }
 0x13b   : > { %1749 = shalt.err (!%p1746_p5)
}
 0x13c   : > { %s1750_s28 = scalar_lea.vmem %s475_s22, 16  ;;  %p2495_p9 = pmov %p2494_p4 }
 0x13d   : > { %p1751_p0 = scmp.ne.s32.totalorder %s475_s22, %s1750_s28  ;;  %s1883_s15 = smov [#allocation20]  }
 0x13e   : > { %s1755_s5 = sshll.u32 %s1883_s15, 4  ;;  %s1756_s5 = int_to_ptr.vmem [resolvable:$false] %s1755_s5 }
 0x13f   : > { %p1753_p11 = pnand %p1751_p0, %p2495_p9  ;;  %s1757_s11 = scalar_lea.vmem %s1756_s5, 32 }
 0x140   : > { %p1758_p4 = scmp.lt.s32.totalorder %s475_s22, %s1756_s5  ;;  %p1759_p10 = scmp.lt.s32.totalorder %s1757_s11, %s1750_s28 }
 0x141   : > { %p1754_p8 = pneg %p1753_p11 }
 0x142   : > { %p1760_p6 = por %p1759_p10, %p1758_p4 }
 0x144   : > { %p1761_p12 = pnand %p1760_p6, %p1754_p8 }
 0x146   : > { %1764 = shalt.err (!%p1761_p12)
}
 0x147   : > { %1334 = dma.hbm_to_vmem [thread:$0]  (!%p2493_p3), %s2284_s27, 16, %s475_s22, %s2160_s8  }
 0x148   : > { %s2496_s30 = sld [smem:[#allocation31_spill]] }
 0x14e   : > { %p2497_p2 = scmp.ne.s32.totalorder %s2496_s30, 0 }
 0x14f   : > { %p2498_p7 = scmp.eq.s32.totalorder (!%p2497_p2), %s1983_s25, 0 }
 0x150   : > { %483 = sbr.rel (%p2497_p2) target bundleno = 1737 (0x6c9), region = 64 }
 0x157   : > { %1818 = dma.done.wait (%p2498_p7), [#allocation4], 256   ;;  %p2499_p1 = pmov %p2498_p7 }
 0x159   : > { %1820 = vsyncadd (%p2499_p1), [#allocation4], 4294967040  ;;  %p2500_p13 = pmov %p2499_p1 }
 0x15a   : > { %p2501_p5 = pmov %p2499_p1 }
 0x15b   : > { %1822 = dma.done.wait (%p2500_p13), [#allocation7], 784  }
 0x15c   : > { %1824 = vsyncadd (%p2501_p5), [#allocation7], 4294966512  ;;  %p2502_p0 = pmov %p2499_p1 }
 0x15e   : > { %1826 = dma.done.wait (%p2502_p0), [#allocation10], 32   ;;  %p2503_p3 = pmov %p2502_p0 }
 0x15f   : > { %p2504_p9 = pmov %p2502_p0 }
 0x160   : > { %1828 = vsyncadd (%p2503_p3), [#allocation10], 4294967264 }
 0x161   : > { %1830 = dma.done.wait (%p2504_p9), [#allocation13], 272   ;;  %p2505_p11 = pmov %p2502_p0 }
 0x162   : > { %p2506_p8 = pmov %p2502_p0 }
 0x163   : > { %1832 = vsyncadd (%p2505_p11), [#allocation13], 4294967024 }
 0x164   : > { %1834 = dma.done.wait (%p2506_p8), [#allocation16], 32   ;;  %p2507_p4 = pmov %p2502_p0 }
 0x165   : > { %s521_s3 = sand.u32 1, %s1983_s25   ;;  %s2332_s8 = sand.u32 1, %s1851_s18  }
 0x166   : > { %1836 = vsyncadd (%p2507_p4), [#allocation16], 4294967264  ;;  %s1177_s9 = sshll.u32 %s2332_s8, 4  ;;  %s522_s27 = scalar_lea.sflag [#allocation19], %s521_s3 }
 0x167   : > { %s2335_s26 = scalar_lea.vmem [#allocation18], %s1177_s9  ;;  %p2508_p10 = scmp.ne.s32.totalorder %s2480_s13, 0 }
 0x169   : > { %1838 = dma.done.wait (%p2508_p10), %s522_s27, 272  }
 0x16a   : > { %1840 = vsyncadd (%p2508_p10), %s522_s27, 4294967024  ;;  %s1178_s16 = sshll.u32 %s2332_s8, 3  ;;  %s533_s22 = scalar_lea.vmem [#allocation20], %s2332_s8 }
 0x16b   : > { %s2343_s29 = scalar_lea.vmem [#allocation21], %s1178_s16  ;;  %s2509_s20 = sld [smem:[#allocation29_spill]] }
 0x171   : > { %p1179_p6 = scmp.ne.s32.totalorder %s2509_s20, 0 }
 0x172   : > { %v1427_v0 = vld [vmem:[#allocation6] sm:$0xff] (!%p1179_p6)   ;;  %v1884_v1 = vmov (!%p1179_p6), 0.0   ;;  %v1428_v2 = vld [vmem:[#allocation6 + $0x8] sm:$0xff] (!%p1179_p6)   ;;  %vm1885_vm0 = vmmov (!%p1179_p6), 0   ;;  %v1429_v3 = vld [vmem:[#allocation6 + $0x10] sm:$0xff] (!%p1179_p6)   ;;  %vm641_vm1 = vcmask (!%p1179_p6), 785408  }
 0x173   : > { %582 = sbr.rel (%p1179_p6) target bundleno = 1494 (0x5d6), region = 112  ;;  %1226 = vmatprep.subr.bf16.mxu0 (!%p1179_p6), %v1884_v1  ;;  %1242 = vmatprep.subr.bf16.mxu1 (!%p1179_p6), %v1884_v1  ;;  %v1430_v4 = vld [vmem:[#allocation6 + $0x18] sm:$0xff] (!%p1179_p6)   ;;  %v1431_v5 = vld [vmem:[#allocation6 + $0x20] sm:$0xff] (!%p1179_p6)   ;;  %v1432_v6 = vld [vmem:[#allocation6 + $0x28] sm:$0xff] (!%p1179_p6)   ;;  %vm698_vm2 = vcmask (!%p1179_p6), 261120  }
 0x174   : > { %1227 = vmatpush3.bf16.msra.mxu0 (!%p1179_p6), %v1427_v0  ;;  %1238 = vmatprep.mubr.msk.bf16.mxu0 (!%p1179_p6), %vm1885_vm0, %v1884_v1  ;;  %v583_v7 = vld [vmem:[#allocation3] sm:$0xff] (!%p1179_p6)  ;;  %v584_v8 = vld [vmem:[#allocation3 + $0x8] sm:$0xff] (!%p1179_p6)  ;;  %v1190_v58 = vld [vmem:[#allocation14] ss:$0 sm:$0xff] (!%p1179_p6) }
 0x175   : > { %1228 = vmatprep.subr.bf16.mxu0 (!%p1179_p6), %v1884_v1  ;;  %1246 = vmatprep.mubr.msk.bf16.mxu1 (!%p1179_p6), %vm1885_vm0, %v1884_v1  ;;  %v585_v9 = vpack.c.bf16 (!%p1179_p6), %v584_v8, %v583_v7  ;;  %v1180_v10 = vld [vmem:[#allocation8] ss:$0 sm:$0xff] (!%p1179_p6)  ;;  %v1433_v39 = vld [vmem:[#allocation12] sm:$0xff] (!%p1179_p6)   ;;  %v1434_v40 = vld [vmem:[#allocation12 + $0x8] sm:$0xff] (!%p1179_p6)  }
 0x176   : > { %1243 = vmatpush3.bf16.msra.mxu1 (!%p1179_p6), %v1433_v39  ;;  %v1188_v49 = vld [vmem:[#allocation9] ss:$0 sm:$0xff] (!%p1179_p6)  ;;  %v1189_v53 = vld [vmem:[#allocation11] ss:$0 sm:$0xff] (!%p1179_p6) }
 0x177   : > { %1244 = vmatprep.subr.bf16.mxu1 (!%p1179_p6), %v1884_v1 }
 0x178   : > { %1229 = vmatpush3.bf16.msra.mxu0 (!%p1179_p6), %v1428_v2 }
 0x179   : > { %1230 = vmatprep.subr.bf16.mxu0 (!%p1179_p6), %v1884_v1 }
 0x17a   : > { %1245 = vmatpush3.bf16.msra.mxu1 %v1434_v40 }
 0x17c   : > { %1231 = vmatpush3.bf16.msra.mxu0 %v1429_v3 }
 0x17d   : > { %1232 = vmatprep.subr.bf16.mxu0 %v1884_v1 }
 0x180   : > { %1233 = vmatpush3.bf16.msra.mxu0 %v1430_v4 }
 0x181   : > { %1234 = vmatprep.subr.bf16.mxu0 %v1884_v1 }
 0x184   : > { %1235 = vmatpush3.bf16.msra.mxu0 %v1431_v5 }
 0x185   : > { %1236 = vmatprep.subr.bf16.mxu0 %v1884_v1 }
 0x188   : > { %1237 = vmatpush3.bf16.msra.mxu0 %v1432_v6 }
 0x18b   : > { %1239 = vmatmul.mubr.msk.bf16.vlgmr.msra.gmra.mrb[0].mxu0 %vm641_vm1, %v585_v9 }
 0x25e   : > { %v679_v11 = vpop.f32.mrb[0].mxu0 }
 0x25f   : > { %v680_v12 = vadd.f32 %v1180_v10, %v679_v11  ;;  %v1240_v13 = vpop.f32.mrb[1].mxu0 }
 0x260   : > { %v682_v14 = vpop.f32.mrb[2].mxu0 }
 0x261   : > { %v688_v15 = vmul.f32 0.70710677, %v680_v12  ;;  %v683_v16 = vadd.f32 %v1180_v10, %v682_v14  ;;  %v1241_v17 = vpop.f32.mrb[3].mxu0  ;;  %v686_v20 = vmul.f32 0.5, %v680_v12 }
 0x263   : > { %1435 = verf.f32 %v688_v15  ;;  %v689_v18 = vmul.f32 0.70710677, %v683_v16  ;;  %v687_v23 = vmul.f32 0.5, %v683_v16 }
 0x265   : > { %1437 = verf.f32 %v689_v18 }
 0x26d   : > { %v1436_v19 = vpop.eup %1435 }
 0x26e   : > { %v692_v21 = vadd.f32 1.0, %v1436_v19 }
 0x26f   : > { %v1438_v22 = vpop.eup %1437 }
 0x270   : > { %v694_v24 = vmul.f32 %v692_v21, %v686_v20  ;;  %v693_v25 = vadd.f32 1.0, %v1438_v22 }
 0x272   : > { %v699_v26 = vsel %vm698_vm2, %v694_v24, 0.0  ;;  %v695_v27 = vmul.f32 %v693_v25, %v687_v23 }
 0x273   : > { %700 = vadd.xlane.f32.xlu0 %v699_v26 }
 0x274   : > { %v702_v28 = vsel %vm698_vm2, %v695_v27, 0.0 }
 0x277   : > { %703 = vadd.xlane.f32.xlu0 %v702_v28 }
 0x300   : > { %v701_v29 = vpop.xlane.xlu0 %700 }
 0x301   : > { %v706_v30 = vmul.f32 0.03125, %v701_v29 }
 0x303   : > { %v708_v31 = vsub.f32 %v694_v24, %v706_v30  ;;  %v1194_v30 = vld [vmem:[#allocation15] ss:$0 sm:$0xff] }
 0x304   : > { %v704_v32 = vpop.xlane.xlu0 %703 }
 0x305   : > { %v707_v33 = vmul.f32 0.03125, %v704_v32  ;;  %v710_v34 = vmul.f32 %v708_v31, %v708_v31 }
 0x307   : > { %v709_v35 = vsub.f32 %v695_v27, %v707_v33  ;;  %v712_v36 = vsel %vm698_vm2, %v710_v34, 0.0 }
 0x308   : > { %713 = vadd.xlane.f32.xlu1 %v712_v36 }
 0x309   : > { %v711_v37 = vmul.f32 %v709_v35, %v709_v35 }
 0x30b   : > { %v715_v38 = vsel %vm698_vm2, %v711_v37, 0.0 }
 0x30c   : > { %716 = vadd.xlane.f32.xlu1 %v715_v38 }
 0x395   : > { %v714_v41 = vpop.xlane.xlu1 %713 }
 0x396   : > { %v718_v42 = vmul.f32 0.03125, %v714_v41 }
 0x398   : > { %v720_v43 = vadd.f32 1e-12, %v718_v42 }
 0x399   : > { %v717_v44 = vpop.xlane.xlu1 %716 }
 0x39a   : > { %1439 = vrsqrt.f32 %v720_v43  ;;  %v719_v45 = vmul.f32 0.03125, %v717_v44 }
 0x39c   : > { %v721_v46 = vadd.f32 1e-12, %v719_v45 }
 0x39e   : > { %1441 = vrsqrt.f32 %v721_v46 }
 0x3a4   : > { %v1440_v47 = vpop.eup %1439 }
 0x3a5   : > { %v724_v48 = vmul.f32 %v1440_v47, %v708_v31 }
 0x3a7   : > { %v732_v52 = vmul.f32 %v1188_v49, %v724_v48 }
 0x3a8   : > { %v1442_v50 = vpop.eup %1441 }
 0x3a9   : > { %v725_v51 = vmul.f32 %v1442_v50, %v709_v35  ;;  %v740_v55 = vadd.f32 %v1189_v53, %v732_v52  ;;  %v1195_v35 = vld [vmem:[#allocation17] ss:$0 sm:$0xff] }
 0x3ab   : > { %v733_v54 = vmul.f32 %v1188_v49, %v725_v51 }
 0x3ad   : > { %v741_v56 = vadd.f32 %v1189_v53, %v733_v54 }
 0x3af   : > { %v742_v57 = vpack.c.bf16 %v741_v56, %v740_v55 }
 0x3b1   : > { %1247 = vmatmul.mubr.msk.bf16.vlgmr.msra.gmra.mrb[0].mxu1 %vm698_vm2, %v742_v57 }
 0x484   : > { %v803_v59 = vpop.f32.mrb[0].mxu1 }
 0x485   : > { %v804_v60 = vadd.f32 %v1190_v58, %v803_v59  ;;  %v1248_v61 = vpop.f32.mrb[1].mxu1 }
 0x486   : > { %v806_v62 = vpop.f32.mrb[2].mxu1 }
 0x487   : > { %v812_v63 = vmul.f32 0.70710677, %v804_v60  ;;  %v807_v0 = vadd.f32 %v1190_v58, %v806_v62  ;;  %v1249_v1 = vpop.f32.mrb[3].mxu1  ;;  %v810_v4 = vmul.f32 0.5, %v804_v60 }
 0x489   : > { %1443 = verf.f32 %v812_v63  ;;  %v813_v2 = vmul.f32 0.70710677, %v807_v0  ;;  %v811_v7 = vmul.f32 0.5, %v807_v0 }
 0x48b   : > { %1445 = verf.f32 %v813_v2 }
 0x493   : > { %v1444_v3 = vpop.eup %1443 }
 0x494   : > { %v816_v5 = vadd.f32 1.0, %v1444_v3 }
 0x495   : > { %v1446_v6 = vpop.eup %1445 }
 0x496   : > { %v818_v8 = vmul.f32 %v816_v5, %v810_v4  ;;  %v817_v9 = vadd.f32 1.0, %v1446_v6 }
 0x498   : > { %v822_v10 = vsel %vm698_vm2, %v818_v8, 0.0  ;;  %v819_v11 = vmul.f32 %v817_v9, %v811_v7 }
 0x499   : > { %823 = vadd.xlane.f32.xlu0 %v822_v10 }
 0x49a   : > { %v825_v12 = vsel %vm698_vm2, %v819_v11, 0.0 }
 0x49b   : > { %826 = vadd.xlane.f32.xlu1 %v825_v12 }
 0x526   : > { %v824_v13 = vpop.xlane.xlu0 %823 }
 0x527   : > { %v828_v14 = vmul.f32 0.03125, %v824_v13 }
 0x528   : > { %v827_v15 = vpop.xlane.xlu1 %826 }
 0x529   : > { %v830_v16 = vsub.f32 %v818_v8, %v828_v14  ;;  %v829_v17 = vmul.f32 0.03125, %v827_v15 }
 0x52b   : > { %v831_v18 = vsub.f32 %v819_v11, %v829_v17  ;;  %v832_v19 = vmul.f32 %v830_v16, %v830_v16 }
 0x52d   : > { %v834_v20 = vsel %vm698_vm2, %v832_v19, 0.0  ;;  %v833_v21 = vmul.f32 %v831_v18, %v831_v18 }
 0x52e   : > { %835 = vadd.xlane.f32.xlu0 %v834_v20 }
 0x52f   : > { %v837_v22 = vsel %vm698_vm2, %v833_v21, 0.0 }
 0x530   : > { %838 = vadd.xlane.f32.xlu1 %v837_v22 }
 0x5bb   : > { %v836_v23 = vpop.xlane.xlu0 %835 }
 0x5bc   : > { %v840_v24 = vmul.f32 0.03125, %v836_v23 }
 0x5bd   : > { %v839_v25 = vpop.xlane.xlu1 %838 }
 0x5be   : > { %v842_v26 = vadd.f32 1e-12, %v840_v24  ;;  %v841_v27 = vmul.f32 0.03125, %v839_v25 }
 0x5c0   : > { %1447 = vrsqrt.f32 %v842_v26  ;;  %v843_v28 = vadd.f32 1e-12, %v841_v27 }
 0x5c2   : > { %1449 = vrsqrt.f32 %v843_v28 }
 0x5ca   : > { %v1448_v29 = vpop.eup %1447 }
 0x5cb   : > { %v846_v31 = vmul.f32 %v1448_v29, %v830_v16 }
 0x5cc   : > { %v1450_v32 = vpop.eup %1449 }
 0x5cd   : > { %v854_v33 = vmul.f32 %v1194_v30, %v846_v31  ;;  %v847_v34 = vmul.f32 %v1450_v32, %v831_v18 }
 0x5cf   : > { %v855_v36 = vmul.f32 %v1194_v30, %v847_v34  ;;  %v862_v37 = vadd.f32 %v1195_v35, %v854_v33 }
 0x5d1   : > { %v863_v38 = vadd.f32 %v1195_v35, %v855_v36 }
 0x5d3   : > { %v864_v39 = vpack.c.bf16 %v863_v38, %v862_v37 }
 0x5d5   : > { %865 = vst.msk [vmem:[#allocation2] sm:$0xff] %vm698_vm2, %v864_v39 }
 0x5d6 PF: > { %s2510_s25 = sld [smem:[#allocation29_spill]]  ;;  %v1451_v40 = vld [vmem:[%s2335_s26] sm:$0xff]   ;;  %v1886_v41 = vmov 0.0   ;;  %v1452_v42 = vld [vmem:[%s2335_s26 + $0x8] sm:$0xff]   ;;  %vm1887_vm3 = vmmov 0   ;;  %vm890_vm4 = vcmask 261120  }
 0x5d7   : > { %1250 = vmatprep.subr.bf16.mxu0 %v1886_v41  ;;  %1254 = vmatprep.mubr.msk.bf16.mxu0 %vm1887_vm3, %v1886_v41  ;;  %v1196_v44 = vld [vmem:[%s533_s22] ss:$0 sm:$0xff]  ;;  %s961_s12 = sshll.u32 %s2343_s29, 4  ;;  %s2511_s10 = sld [smem:[#allocation42_spill]]  ;;  %s2377_s12 = int_to_ptr.vmem [resolvable:$true] %s961_s12 }
 0x5d8   : > { %1251 = vmatpush3.bf16.msra.mxu0 %v1451_v40  ;;  %s946_s15 = scalar_lea.sflag [#allocation5], %s2332_s8  ;;  %s1765_s5 = scalar_lea.vmem %s2377_s12, 128 }
 0x5d9   : > { %1252 = vmatprep.subr.bf16.mxu0 %v1886_v41  ;;  %p1766_p12 = scmp.ne.s32.totalorder %s2377_s12, %s1765_s5  ;;  %p2512_p2 = scmp.ne.s32.totalorder %s2481_s24, 0 }
 0x5da   : > { %s1888_s11 = smov [#allocation21]  }
 0x5db   : > { %p1767_p7 = pnand %p1766_p12, %p2512_p2  ;;  %s1769_s30 = sshll.u32 %s1888_s11, 4  ;;  %s1770_s30 = int_to_ptr.vmem [resolvable:$false] %s1769_s30 }
 0x5dc   : > { %1253 = vmatpush3.bf16.msra.mxu0 %v1452_v42  ;;  %v866_v43 = vld [vmem:[#allocation2] sm:$0xff]  ;;  %s1203_s13 = sshll.u32 %s2510_s25, 6  ;;  %s1771_s3 = scalar_lea.vmem %s1770_s30, 256 }
 0x5dd   : > { %s2375_s28 = scalar_lea.hbm %s2511_s10, %s1203_s13  ;;  %p1768_p1 = pneg %p1767_p7 }
 0x5de   : > { %p1772_p13 = scmp.lt.s32.totalorder %s2377_s12, %s1770_s30  ;;  %p1773_p5 = scmp.lt.s32.totalorder %s1771_s3, %s1765_s5 }
 0x5df   : > { %1255 = vmatmul.mubr.msk.bf16.vlgmr.msra.gmra.mrb[0].mxu0 %vm890_vm4, %v866_v43 }
 0x5e0   : > { %p1774_p0 = por %p1773_p5, %p1772_p13 }
 0x5e2   : > { %p1775_p3 = pnand %p1774_p0, %p1768_p1 }
 0x6b2   : > { %v928_v45 = vpop.f32.mrb[0].mxu0 }
 0x6b3   : > { %v1256_v46 = vpop.f32.mrb[1].mxu0  ;;  %v929_v48 = vadd.f32 %v1196_v44, %v928_v45 }
 0x6b4   : > { %v931_v47 = vpop.f32.mrb[2].mxu0 }
 0x6b5   : > { %v932_v49 = vadd.f32 %v1196_v44, %v931_v47  ;;  %v1257_v50 = vpop.f32.mrb[3].mxu0 }
 0x6b7   : > { %v1211_v51 = vpack.c.bf16 %v932_v49, %v929_v48 }
 0x6b9   : > { %1212 = vst [vmem:[%s2343_s29] sm:$0xff] %v1211_v51  }
 0x6ba   : > { %1778 = shalt.err (!%p1775_p3)
}
 0x6bb   : > { %s1779_s9 = scalar_lea.hbm %s2375_s28, 128  ;;  %s1783_s16 = scalar_lea.hbm %s2511_s10, 256 }
 0x6bc   : > { %p1780_p9 = scmp.ne.s32.totalorder %s2375_s28, %s1779_s9  ;;  %p1784_p4 = scmp.lt.u32.totalorder %s2375_s28, %s2511_s10 }
 0x6bd   : > { %p1785_p10 = scmp.lt.u32.totalorder %s1783_s16, %s1779_s9  ;;  %p1787_p12 = scmp.lt.u32.totalorder %s1779_s9, %s2375_s28 }
 0x6be   : > { %p1781_p11 = pnand %p1780_p9, %p2512_p2 }
 0x6bf   : > { %p1786_p6 = por %p1785_p10, %p1784_p4 }
 0x6c0   : > { %p1782_p8 = pneg %p1781_p11 }
 0x6c1   : > { %p1788_p7 = por %p1787_p12, %p1786_p6 }
 0x6c3   : > { %p1789_p1 = pnand %p1788_p7, %p1782_p8 }
 0x6c5   : > { %1792 = shalt.err (!%p1789_p1)
}
 0x6c6   : > { %s1889_s20 = smov 64   ;;  %s1890_s25 = smov 128  }
 0x6c7   : > { %s1891_s13 = smov 4  }
 0x6c8   : > { %1298 = dma.vmem_to_hbm [thread:$0]  (%p2512_p2), %s2377_s12, 128, %s2375_s28, %s946_s15, %s1889_s20, %s1890_s25, %s1891_s13  }
 0x6c9 PF: > { %s2513_s23 = sld [smem:[#allocation34_spill]]  ;;  %s2514_s7 = sld [smem:[#allocation30_spill]] }
 0x6ca   : > { %s976_s5 = sand.u32 1, %s1847_s17  }
 0x6cb   : > { %s977_s11 = scalar_lea.sflag [#allocation5], %s976_s5 }
 0x6cf   : > { %p2515_p13 = scmp.ne.s32.totalorder %s2513_s23, 0  ;;  %p2516_p5 = scmp.ge.s32.totalorder %s2514_s7, 2 }
 0x6d1   : > { %p1336_p0 = pnand %p2516_p5, %p2515_p13 }
 0x6d3   : > { %1842 = dma.done.wait (!%p1336_p0), %s977_s11, 128  }
 0x6d4   : > { %1844 = vsyncadd (!%p1336_p0), %s977_s11, 4294967168  ;;  %s32_s22 = sadd.s32 1, %s2514_s7   ;;  %s2517_s30 = sld [smem:[#allocation33_spill]] }
 0x6d5   : > { %p29_p3 = scmp.ge.s32.totalorder %s32_s22, 4   ;;  %s2518_s24 = sld [smem:[#allocation32_spill]] }
 0x6d6   : > { %s2519_s17 = smov %s1851_s18  ;;  %s2520_s18 = smov %s1855_s19 }
 0x6d7   : > { %s2522_s20 = smov %s1863_s21  ;;  %31 = sbr.rel (!%p29_p3) target bundleno = 20 (0x14), region = 162 }
 0x6da   : > { %s2521_s19 = smov %s2517_s30 }
 0x6db   : > { %s2523_s21 = smov %s2518_s24 }
 0x6de   :  { %982 = vsyncpa [#allocation4], 1 }
 0x6df   :  { %984 = vsyncpa [#allocation4 + $0x1], 1 }
 0x6e0   :  { %985 = vsyncpa [#allocation7], 1 }
 0x6e1   :  { %986 = vsyncpa [#allocation10], 1 }
 0x6e2   :  { %987 = vsyncpa [#allocation13], 1 }
 0x6e3   :  { %988 = vsyncpa [#allocation16], 1 }
 0x6e4   :  { %989 = vsyncpa [#allocation19], 1 }
 0x6e5   :  { %991 = vsyncpa [#allocation19 + $0x1], 1 }
 0x6e6   :  { %992 = vsyncpa [#allocation5], 1 }
 0x6e7   :  { %994 = vsyncpa [#allocation5 + $0x1], 1 }

</bundles_post_ra>
